<compile_context>
chip_gen: v7x
topology: tpu7x:2x2x1
jax: 0.10.0
libtpu: 0.0.40
codegen_flags: <defaults>
</compile_context>

<pallas_src>
import math

import jax
import jax.numpy as jnp
from jax import lax
from jax.experimental import pallas as pl

# ---- hyper-parameters consistent with the PyTorch module ----
D_MODEL = 32
N_HEADS = 4
D_HEAD = D_MODEL // N_HEADS
BLOCK_SIZE = 8
BATCH = 2
SEQ_LEN = 12          # not a multiple of BLOCK_SIZE -> exercises the padding path
EPS = 1e-5            # nn.LayerNorm default eps
NEG_INF = -1e9

PAD = (BLOCK_SIZE - SEQ_LEN % BLOCK_SIZE) % BLOCK_SIZE
P_LEN = SEQ_LEN + PAD             # 16 padded tokens per batch
NB = P_LEN // BLOCK_SIZE          # 2 blocks per batch
BP = BATCH * P_LEN                # 32 token rows (all batches fused)
HR = N_HEADS * BP                 # 128 lane-packed (head, key) columns, local stage
NG = BATCH * NB                   # 4 real (batch, block) summary rows
R2P = 8                           # summary rows padded to one sublane tile
HR2 = N_HEADS * R2P               # 32 lane-packed (head, key) columns, summary stage

# ---- weight+bias slab layout (W_ROWS, W_COLS) f32: every sub-weight starts on a
#      128-lane boundary so all in-kernel weight/product slices are lane aligned ----
C_WQ, C_WK, C_WV = 0, 128, 256            # local QKV (product reuses same offsets)
C_WO = 384
C_WQ2, C_WK2, C_WV2 = 512, 640, 768       # summary QKV, pre-fused with summarizer
C_WO2 = 896
C_W1 = 1024                               # FFN up (32 -> 64)
C_W2T = 1152                              # FFN down, stored transposed (32, 64)
W_COLS = 1280
R_W = 32                                  # weight rows 0:32
R_BQKV, R_BO, R_BQKV2, R_BO2 = 32, 33, 34, 35
R_B1, R_B2 = 36, 37
R_G1, R_BE1, R_G2, R_BE2 = 38, 39, 40, 41
W_ROWS = 48

# ---- constants slab layout (128, 256) f32 ----
#   rows 0:128 , cols   0:32  -> head mask, local stage        (HR , D)
#   rows 0:32  , cols 128:256 -> local score bias + -1e9 mask  (BP , HR)
#   rows 32:64 , cols 128:160 -> head mask, summary stage      (HR2, D)
#   rows 64:96 , cols 128:136 -> summary->token distribution   (BP , R2P)
#   rows 96:104, cols 128:160 -> block pooling weights         (R2P, BP)
#   rows 104:112,cols 128:160 -> summary score bias + mask     (R2P, HR2)
C_ROWS, C_COLS = 128, 256


# ------------------------------ kernel helpers ------------------------------
def _gelu_tanh(x):
    # tanh-form GELU (EUP) in place of the exact erf; error << 1e-3 for these ranges.
    c = math.sqrt(2.0 / math.pi)
    return 0.5 * x * (1.0 + jnp.tanh(c * (x + 0.044715 * (x * x * x))))


def _layernorm(t, g, b):
    m = jnp.mean(t, axis=-1, keepdims=True)
    v = jnp.mean((t - m) ** 2, axis=-1, keepdims=True)
    return (t - m) * lax.rsqrt(v + EPS) * g + b


def _packed_mha(q, k, v, hmask, bias, scale):
    """All heads in one pass, heads packed along lanes.

    q, k, v : (R, D).  hmask: (H*R, D) 0/1 head selector.  bias: (R, H*R) f32
    position-bias + -1e9 block/batch mask (enforces all structure).
    Returns (R, D) context with head h occupying lanes [h*D_HEAD,(h+1)*D_HEAD)
    -- i.e. already in "concatenated heads" layout, no lane-shuffle concat.
    """
    k_stack = jnp.concatenate([k] * N_HEADS, axis=0) * hmask      # (H*R, D)
    v_stack = jnp.concatenate([v] * N_HEADS, axis=0) * hmask      # (H*R, D)
    # Q @ K_stack^T without an explicit transpose: one lane-dense (R, H*R) slab.
    s = lax.dot_general(q, k_stack, (((1,), (1,)), ((), ())),
                        preferred_element_type=jnp.float32) * scale + bias
    # one exp; row-max subtraction is constant within each head segment, so the
    # per-head softmax is unchanged.  -1e9 masked lanes underflow to exactly 0.
    e = jnp.exp(s - jnp.max(s, axis=-1, keepdims=True))
    ctx = jnp.dot(e, v_stack, preferred_element_type=jnp.float32)  # (R, D) unnormalized
    den = jnp.dot(e, hmask, preferred_element_type=jnp.float32)    # per-head denominator,
    return ctx * pl.reciprocal(den, approx=True)                   # broadcast on head lanes


# --------------------------------- kernel -----------------------------------
def _fused_kernel(x_ref, w_ref, c_ref, o_ref):
    D = D_MODEL
    scale = 1.0 / math.sqrt(D_HEAD)

    x = x_ref[...]                                            # (BP, D)

    hmask1 = c_ref[0:HR, 0:D]                                 # (128, 32)
    bias1 = c_ref[0:BP, 128:128 + HR]                         # (32, 128)  f32 bias+mask
    hmask2 = c_ref[32:64, 128:128 + D]                        # (32, 32)
    wdist = c_ref[64:96, 128:128 + R2P]                       # (32, 8)
    wpool = c_ref[96:104, 128:128 + BP]                       # (8, 32)
    bias2 = c_ref[104:112, 128:128 + HR2]                     # (8, 32)

    # ---- stage 1: block-local MHA (block structure lives in bias1's -1e9) ----
    qkv = (jnp.dot(x, w_ref[0:R_W, C_WQ:C_WQ + 3 * 128],
                   preferred_element_type=jnp.float32)
           + w_ref[R_BQKV:R_BQKV + 1, C_WQ:C_WQ + 3 * 128])           # (32, 384)
    ctx1 = _packed_mha(qkv[:, C_WQ:C_WQ + D],                          # q  (lane 0)
                       qkv[:, C_WK:C_WK + D],                          # k  (lane 128)
                       qkv[:, C_WV:C_WV + D],                          # v  (lane 256)
                       hmask1, bias1, scale)
    local = (jnp.dot(ctx1, w_ref[0:R_W, C_WO:C_WO + D],
                     preferred_element_type=jnp.float32)
             + w_ref[R_BO:R_BO + 1, C_WO:C_WO + D])                    # (32, 32)

    # ---- stage 2: block pooling -> (pre-fused summarizer+QKV) -> summary MHA ----
    pooled = jnp.dot(wpool, local, preferred_element_type=jnp.float32)  # (8, 32)
    qkv2 = (jnp.dot(pooled, w_ref[0:R_W, C_WQ2:C_WQ2 + 3 * 128],
                    preferred_element_type=jnp.float32)
            + w_ref[R_BQKV2:R_BQKV2 + 1, C_WQ2:C_WQ2 + 3 * 128])        # (8, 384)
    ctx2 = _packed_mha(qkv2[:, 0:D], qkv2[:, 128:128 + D], qkv2[:, 256:256 + D],
                       hmask2, bias2, scale)                            # (8, 32)
    summary = (jnp.dot(ctx2, w_ref[0:R_W, C_WO2:C_WO2 + D],
                       preferred_element_type=jnp.float32)
               + w_ref[R_BO2:R_BO2 + 1, C_WO2:C_WO2 + D])               # (8, 32)
    dist = jnp.dot(wdist, summary, preferred_element_type=jnp.float32)  # (32, 32)

    # ---- residual + LN1, FFN (GELU tanh form on the EUP), residual + LN2 ----
    x1 = _layernorm(local + dist + x,
                    w_ref[R_G1:R_G1 + 1, 0:D], w_ref[R_BE1:R_BE1 + 1, 0:D])
    hid = _gelu_tanh(jnp.dot(x1, w_ref[0:R_W, C_W1:C_W1 + 2 * D],
                             preferred_element_type=jnp.float32)
                     + w_ref[R_B1:R_B1 + 1, C_W1:C_W1 + 2 * D])          # (32, 64)
    ff = (lax.dot_general(hid, w_ref[0:R_W, C_W2T:C_W2T + 2 * D],        # w2 stored ^T
                          (((1,), (1,)), ((), ())),
                          preferred_element_type=jnp.float32)
          + w_ref[R_B2:R_B2 + 1, C_W2T:C_W2T + D])                       # (32, 32)
    o_ref[...] = _layernorm(ff + x1,
                            w_ref[R_G2:R_G2 + 1, 0:D], w_ref[R_BE2:R_BE2 + 1, 0:D])


# ------------------------- one-time (init) parameter packing -------------------------
def pack_params(params):
    """Pack the 28 PyTorch-style parameters into two TPU-friendly slabs.

    Called ONCE at init (cache per parameter set); deliberately NOT in the
    per-call path, which is just pad/reshape(x) + the kernel.
    """
    (pos_bias, wvec, wq, bq, wk, bk, wv, bv, wo, bo, ws, bsum,
     wq2, bq2, wk2, bk2, wv2, bv2, wo2, bo2,
     g1, be1, w1, b1, w2, b2, g2, be2) = params
    f32 = jnp.float32

    # fold the summarizer Linear into the summary-attention QKV projections:
    #   (pooled @ ws + bs) @ wq2 + bq2  ==  pooled @ (ws@wq2) + (bs@wq2 + bq2)
    wq2f, wk2f, wv2f = ws @ wq2, ws @ wk2, ws @ wv2
    bq2f, bk2f, bv2f = bsum @ wq2 + bq2, bsum @ wk2 + bk2, bsum @ wv2 + bv2

    def put(dst, r, c, a):
        a = jnp.asarray(a, f32)
        return dst.at[r:r + a.shape[0], c:c + a.shape[1]].set(a)

    W = jnp.zeros((W_ROWS, W_COLS), f32)
    W = put(W, 0, C_WQ, wq); W = put(W, 0, C_WK, wk); W = put(W, 0, C_WV, wv)
    W = put(W, 0, C_WO, wo)
    W = put(W, 0, C_WQ2, wq2f); W = put(W, 0, C_WK2, wk2f); W = put(W, 0, C_WV2, wv2f)
    W = put(W, 0, C_WO2, wo2)
    W = put(W, 0, C_W1, w1)
    W = put(W, 0, C_W2T, w2.T)
    W = put(W, R_BQKV, C_WQ, bq); W = put(W, R_BQKV, C_WK, bk); W = put(W, R_BQKV, C_WV, bv)
    W = put(W, R_BO, C_WO, bo)
    W = put(W, R_BQKV2, C_WQ2, bq2f); W = put(W, R_BQKV2, C_WK2, bk2f)
    W = put(W, R_BQKV2, C_WV2, bv2f)
    W = put(W, R_BO2, C_WO2, bo2)
    W = put(W, R_B1, C_W1, b1)
    W = put(W, R_B2, C_W2T, b2)
    W = put(W, R_G1, 0, g1); W = put(W, R_BE1, 0, be1)
    W = put(W, R_G2, 0, g2); W = put(W, R_BE2, 0, be2)

    # ---- structure constants ----
    head_of_dim = jnp.arange(D_MODEL) // D_HEAD
    hm1 = (jnp.repeat(jnp.arange(N_HEADS), BP)[:, None] == head_of_dim[None, :]).astype(f32)
    hm2 = (jnp.repeat(jnp.arange(N_HEADS), R2P)[:, None] == head_of_dim[None, :]).astype(f32)

    # local score bias/mask, lane-packed per head: (BP, H*BP)
    eye_g = jnp.eye(NG, dtype=f32)
    neg = (1.0 - jnp.kron(eye_g, jnp.ones((BLOCK_SIZE, BLOCK_SIZE), f32))) * NEG_INF
    pb = jnp.asarray(pos_bias[0], f32)                    # (H, BS, BS)
    bias1 = jnp.concatenate(
        [jnp.kron(eye_g, pb[h]) + neg for h in range(N_HEADS)], axis=1)

    # summary score mask (per-batch isolation; pad rows fully masked): (R2P, H*R2P)
    bid = jnp.repeat(jnp.arange(BATCH), NB)
    sb_real = jnp.where(bid[:, None] == bid[None, :], 0.0, NEG_INF).astype(f32)
    sb = jnp.full((R2P, R2P), NEG_INF, f32).at[0:NG, 0:NG].set(sb_real)
    bias2 = jnp.tile(sb, (1, N_HEADS))

    # softmax-weighted block pooling / summary re-distribution as matmul operands
    wpool = jnp.zeros((R2P, BP), f32).at[0:NG, :].set(
        jnp.kron(eye_g, jnp.asarray(wvec, f32).reshape(1, BLOCK_SIZE)))
    wdist = jnp.zeros((BP, R2P), f32).at[:, 0:NG].set(
        jnp.kron(eye_g, jnp.ones((BLOCK_SIZE, 1), f32)))

    C = jnp.zeros((C_ROWS, C_COLS), f32)
    C = put(C, 0, 0, hm1)
    C = put(C, 0, 128, bias1)
    C = put(C, 32, 128, hm2)
    C = put(C, 64, 128, wdist)
    C = put(C, 96, 128, wpool)
    C = put(C, 104, 128, bias2)
    return jax.device_put(W), jax.device_put(C)


# --------------------------------- per-call wrapper ----------------------------------
@jax.jit
def enhanced_transformer_block(x, w_slab, c_slab):
    """Pallas-backed forward.  Per-call host work: pad/reshape x, one pallas_call,
    slice padding (free layout plumbing)."""
    b, s, d = x.shape
    pad = (BLOCK_SIZE - s % BLOCK_SIZE) % BLOCK_SIZE
    p = s + pad
    xp = jnp.pad(x, ((0, 0), (0, pad), (0, 0))).reshape(b * p, d)
    out = pl.pallas_call(
        _fused_kernel,
        out_shape=jax.ShapeDtypeStruct((b * p, d), x.dtype),
    )(xp, w_slab, c_slab)
    return out.reshape(b, p, d)[:, :s, :]


# ------------------------- pure-JAX reference (ground truth) -------------------------
def reference(x, params):
    (pos_bias, wvec, wq, bq, wk, bk, wv, bv, wo, bo, ws, bsum,
     wq2, bq2, wk2, bk2, wv2, bv2, wo2, bo2,
     g1, be1, w1, b1, w2, b2, g2, be2) = params
    B, S, D = x.shape
    pad = (BLOCK_SIZE - S % BLOCK_SIZE) % BLOCK_SIZE
    P = S + pad
    nb = P // BLOCK_SIZE
    xp = jnp.pad(x, ((0, 0), (0, pad), (0, 0)))
    xr = xp.reshape(B * nb, BLOCK_SIZE, D)

    def mha(t, wq, bq, wk, bk, wv, bv, wo, bo, bias=None):
        b, s, d = t.shape
        q = (t @ wq + bq).reshape(b, s, N_HEADS, D_HEAD).transpose(0, 2, 1, 3)
        k = (t @ wk + bk).reshape(b, s, N_HEADS, D_HEAD).transpose(0, 2, 1, 3)
        v = (t @ wv + bv).reshape(b, s, N_HEADS, D_HEAD).transpose(0, 2, 1, 3)
        scores = jnp.einsum('bhqd,bhkd->bhqk', q, k) / math.sqrt(D_HEAD)
        if bias is not None:
            scores = scores + bias[:, :, :s, :s]
        attn = jax.nn.softmax(scores, axis=-1)
        ctx = jnp.einsum('bhqk,bhkd->bhqd', attn, v)
        ctx = ctx.transpose(0, 2, 1, 3).reshape(b, s, d)
        return ctx @ wo + bo

    local = mha(xr, wq, bq, wk, bk, wv, bv, wo, bo, bias=pos_bias).reshape(B, P, D)
    block_view = local.reshape(B, nb, BLOCK_SIZE, D)
    summary_in = (block_view * wvec.reshape(1, 1, BLOCK_SIZE, 1)).sum(axis=2)
    summary_tokens = summary_in @ ws + bsum
    summary_ctx = mha(summary_tokens, wq2, bq2, wk2, bk2, wv2, bv2, wo2, bo2)
    dist = jnp.broadcast_to(summary_ctx[:, :, None, :],
                            (B, nb, BLOCK_SIZE, D)).reshape(B, P, D)
    attended = (local + dist)[:, :S, :]

    def ln(t, g, b):
        m = jnp.mean(t, -1, keepdims=True)
        v = jnp.mean((t - m) ** 2, -1, keepdims=True)
        return (t - m) * jax.lax.rsqrt(v + EPS) * g + b

    x1 = ln(attended + x, g1, be1)
    ff = jax.nn.gelu(x1 @ w1 + b1, approximate=False) @ w2 + b2
    return ln(ff + x1, g2, be2)


# ------------------------- deterministic parameter init -------------------------
def init_params(key):
    ks = list(jax.random.split(key, 12))

    def lin(k, din, dout, scale=0.1):
        kw2, kb2 = jax.random.split(k)
        return (jax.random.normal(kw2, (din, dout), jnp.float32) * scale,
                jax.random.normal(kb2, (1, dout), jnp.float32) * scale)

    pos_bias = jax.random.normal(ks[0], (1, N_HEADS, BLOCK_SIZE, BLOCK_SIZE),
                                 jnp.float32) * 0.1
    wq, bq = lin(ks[1], D_MODEL, D_MODEL)
    wk, bk = lin(ks[2], D_MODEL, D_MODEL)
    wv, bv = lin(ks[3], D_MODEL, D_MODEL)
    wo, bo = lin(ks[4], D_MODEL, D_MODEL)
    ws, bsum = lin(ks[5], D_MODEL, D_MODEL)
    wq2, bq2 = lin(ks[6], D_MODEL, D_MODEL)
    wk2, bk2 = lin(ks[7], D_MODEL, D_MODEL)
    wv2, bv2 = lin(ks[8], D_MODEL, D_MODEL)
    wo2, bo2 = lin(ks[9], D_MODEL, D_MODEL)
    g1 = jnp.ones((1, D_MODEL), jnp.float32)
    be1 = jnp.zeros((1, D_MODEL), jnp.float32)
    w1, b1 = lin(ks[10], D_MODEL, 2 * D_MODEL)
    w2, b2 = lin(ks[11], 2 * D_MODEL, D_MODEL)
    g2 = jnp.ones((1, D_MODEL), jnp.float32)
    be2 = jnp.zeros((1, D_MODEL), jnp.float32)
    return (pos_bias, wq, bq, wk, bk, wv, bv, wo, bo, ws, bsum,
            wq2, bq2, wk2, bk2, wv2, bv2, wo2, bo2,
            g1, be1, w1, b1, w2, b2, g2, be2)


if __name__ == "__main__":
    key = jax.random.PRNGKey(0)
    kx, kp, kw = jax.random.split(key, 3)

    x = jax.random.normal(kx, (BATCH, SEQ_LEN, D_MODEL), jnp.float32)
    raw = init_params(kp)
    # PyTorch draws these pooling weights with torch.randn at forward time;
    # here they come deterministically from the PRNG key.
    wvec = jax.nn.softmax(jax.random.normal(kw, (BLOCK_SIZE,), jnp.float32))[None, :]
    params = (raw[0], wvec) + raw[1:]

    # ---- one-time packing (init-time; cache this per parameter set) ----
    w_slab, c_slab = pack_params(params)

    out = jax.block_until_ready(enhanced_transformer_block(x, w_slab, c_slab))
    ref = jax.block_until_ready(reference(x, params))

    assert out.shape == (BATCH, SEQ_LEN, D_MODEL)
    err = float(jnp.max(jnp.abs(out - ref)))
    assert err < 2e-3, f"max abs err {err}"
    print("KERNEL_OK")
</pallas_src>

<mosaic_0001>
module attributes {stable_mosaic.version = 11 : i64} {
  func.func @_fused_kernel(%arg0: memref<32x32xf32, #tpu.memory_space<vmem>>, %arg1: memref<48x1280xf32, #tpu.memory_space<vmem>>, %arg2: memref<128x256xf32, #tpu.memory_space<vmem>>, %arg3: memref<32x32xf32, #tpu.memory_space<vmem>>) attributes {dimension_semantics = [], scalar_prefetch = 0 : i64, scratch_operands = 0 : i64, tpu.core_type = #tpu.core_type<tc>} {
    %c0 = arith.constant 0 : index
    %c0_0 = arith.constant 0 : index
    %0 = vector.load %arg0[%c0, %c0_0] : memref<32x32xf32, #tpu.memory_space<vmem>>, vector<32x32xf32>
    %c0_1 = arith.constant 0 : index
    %c0_2 = arith.constant 0 : index
    %1 = vector.load %arg2[%c0_1, %c0_2] : memref<128x256xf32, #tpu.memory_space<vmem>>, vector<128x32xf32>
    %c0_3 = arith.constant 0 : index
    %c128 = arith.constant 128 : index
    %2 = vector.load %arg2[%c0_3, %c128] : memref<128x256xf32, #tpu.memory_space<vmem>>, vector<32x128xf32>
    %c32 = arith.constant 32 : index
    %c128_4 = arith.constant 128 : index
    %3 = vector.load %arg2[%c32, %c128_4] : memref<128x256xf32, #tpu.memory_space<vmem>>, vector<32x32xf32>
    %c64 = arith.constant 64 : index
    %c128_5 = arith.constant 128 : index
    %4 = vector.load %arg2[%c64, %c128_5] : memref<128x256xf32, #tpu.memory_space<vmem>>, vector<32x8xf32>
    %c96 = arith.constant 96 : index
    %c128_6 = arith.constant 128 : index
    %5 = vector.load %arg2[%c96, %c128_6] : memref<128x256xf32, #tpu.memory_space<vmem>>, vector<8x32xf32>
    %c104 = arith.constant 104 : index
    %c128_7 = arith.constant 128 : index
    %6 = vector.load %arg2[%c104, %c128_7] : memref<128x256xf32, #tpu.memory_space<vmem>>, vector<8x32xf32>
    %c0_8 = arith.constant 0 : index
    %c0_9 = arith.constant 0 : index
    %7 = vector.load %arg1[%c0_8, %c0_9] : memref<48x1280xf32, #tpu.memory_space<vmem>>, vector<32x384xf32>
    %cst = arith.constant dense<0.000000e+00> : vector<32x384xf32>
    %8 = tpu.matmul %0, %7, %cst {dimension_numbers = #tpu.dot_dimension_numbers<[1], [0], [0], [1], [0, 0, 1, 1], [], []>} : vector<32x32xf32>, vector<32x384xf32>, vector<32x384xf32> -> vector<32x384xf32>
    %c32_10 = arith.constant 32 : index
    %c0_11 = arith.constant 0 : index
    %9 = vector.load %arg1[%c32_10, %c0_11] : memref<48x1280xf32, #tpu.memory_space<vmem>>, vector<1x384xf32>
    %10 = vector.broadcast %9 : vector<1x384xf32> to vector<32x384xf32>
    %11 = arith.addf %8, %10 : vector<32x384xf32>
    %12 = vector.extract_strided_slice %11 {offsets = [0, 0], sizes = [32, 32], strides = [1, 1]} : vector<32x384xf32> to vector<32x32xf32>
    %13 = vector.extract_strided_slice %11 {offsets = [0, 128], sizes = [32, 32], strides = [1, 1]} : vector<32x384xf32> to vector<32x32xf32>
    %14 = vector.extract_strided_slice %11 {offsets = [0, 256], sizes = [32, 32], strides = [1, 1]} : vector<32x384xf32> to vector<32x32xf32>
    %15 = tpu.concatenate %13, %13, %13, %13 in 0 : vector<32x32xf32>, vector<32x32xf32>, vector<32x32xf32>, vector<32x32xf32> -> vector<128x32xf32>
    %16 = arith.mulf %15, %1 : vector<128x32xf32>
    %17 = tpu.concatenate %14, %14, %14, %14 in 0 : vector<32x32xf32>, vector<32x32xf32>, vector<32x32xf32>, vector<32x32xf32> -> vector<128x32xf32>
    %18 = arith.mulf %17, %1 : vector<128x32xf32>
    %cst_12 = arith.constant dense<0.000000e+00> : vector<32x128xf32>
    %19 = tpu.matmul %12, %16, %cst_12 {dimension_numbers = #tpu.dot_dimension_numbers<[1], [1], [0], [0], [0, 0, 1, 0], [], []>} : vector<32x32xf32>, vector<128x32xf32>, vector<32x128xf32> -> vector<32x128xf32>
    %cst_13 = arith.constant 0.353553385 : f32
    %20 = vector.broadcast %cst_13 : f32 to vector<32x128xf32>
    %21 = arith.mulf %19, %20 : vector<32x128xf32>
    %22 = arith.addf %21, %2 : vector<32x128xf32>
    %cst_14 = arith.constant dense<0xFF800000> : vector<32xf32>
    %23 = vector.multi_reduction <maximumf>, %22, %cst_14 [1] : vector<32x128xf32> to vector<32xf32>
    %24 = vector.shape_cast %23 : vector<32xf32> to vector<32x1xf32>
    %25 = vector.broadcast %24 : vector<32x1xf32> to vector<32x128xf32>
    %26 = arith.subf %22, %25 : vector<32x128xf32>
    %27 = math.exp %26 : vector<32x128xf32>
    %cst_15 = arith.constant dense<0.000000e+00> : vector<32x32xf32>
    %28 = tpu.matmul %27, %18, %cst_15 {dimension_numbers = #tpu.dot_dimension_numbers<[1], [0], [0], [1], [0, 0, 1, 1], [], []>} : vector<32x128xf32>, vector<128x32xf32>, vector<32x32xf32> -> vector<32x32xf32>
    %cst_16 = arith.constant dense<0.000000e+00> : vector<32x32xf32>
    %29 = tpu.matmul %27, %1, %cst_16 {dimension_numbers = #tpu.dot_dimension_numbers<[1], [0], [0], [1], [0, 0, 1, 1], [], []>} : vector<32x128xf32>, vector<128x32xf32>, vector<32x32xf32> -> vector<32x32xf32>
    %30 = tpu.reciprocal %29 {approx = true} : vector<32x32xf32> -> vector<32x32xf32>
    %31 = arith.mulf %28, %30 : vector<32x32xf32>
    %c0_17 = arith.constant 0 : index
    %c384 = arith.constant 384 : index
    %32 = vector.load %arg1[%c0_17, %c384] : memref<48x1280xf32, #tpu.memory_space<vmem>>, vector<32x32xf32>
    %cst_18 = arith.constant dense<0.000000e+00> : vector<32x32xf32>
    %33 = tpu.matmul %31, %32, %cst_18 {dimension_numbers = #tpu.dot_dimension_numbers<[1], [0], [0], [1], [0, 0, 1, 1], [], []>} : vector<32x32xf32>, vector<32x32xf32>, vector<32x32xf32> -> vector<32x32xf32>
    %c33 = arith.constant 33 : index
    %c384_19 = arith.constant 384 : index
    %34 = vector.load %arg1[%c33, %c384_19] : memref<48x1280xf32, #tpu.memory_space<vmem>>, vector<1x32xf32>
    %35 = vector.broadcast %34 : vector<1x32xf32> to vector<32x32xf32>
    %36 = arith.addf %33, %35 : vector<32x32xf32>
    %cst_20 = arith.constant dense<0.000000e+00> : vector<8x32xf32>
    %37 = tpu.matmul %5, %36, %cst_20 {dimension_numbers = #tpu.dot_dimension_numbers<[1], [0], [0], [1], [0, 0, 1, 1], [], []>} : vector<8x32xf32>, vector<32x32xf32>, vector<8x32xf32> -> vector<8x32xf32>
    %c0_21 = arith.constant 0 : index
    %c512 = arith.constant 512 : index
    %38 = vector.load %arg1[%c0_21, %c512] : memref<48x1280xf32, #tpu.memory_space<vmem>>, vector<32x384xf32>
    %cst_22 = arith.constant dense<0.000000e+00> : vector<8x384xf32>
    %39 = tpu.matmul %37, %38, %cst_22 {dimension_numbers = #tpu.dot_dimension_numbers<[1], [0], [0], [1], [0, 0, 1, 1], [], []>} : vector<8x32xf32>, vector<32x384xf32>, vector<8x384xf32> -> vector<8x384xf32>
    %c34 = arith.constant 34 : index
    %c512_23 = arith.constant 512 : index
    %40 = vector.load %arg1[%c34, %c512_23] : memref<48x1280xf32, #tpu.memory_space<vmem>>, vector<1x384xf32>
    %41 = vector.broadcast %40 : vector<1x384xf32> to vector<8x384xf32>
    %42 = arith.addf %39, %41 : vector<8x384xf32>
    %43 = vector.extract_strided_slice %42 {offsets = [0, 0], sizes = [8, 32], strides = [1, 1]} : vector<8x384xf32> to vector<8x32xf32>
    %44 = vector.extract_strided_slice %42 {offsets = [0, 128], sizes = [8, 32], strides = [1, 1]} : vector<8x384xf32> to vector<8x32xf32>
    %45 = vector.extract_strided_slice %42 {offsets = [0, 256], sizes = [8, 32], strides = [1, 1]} : vector<8x384xf32> to vector<8x32xf32>
    %46 = tpu.concatenate %44, %44, %44, %44 in 0 : vector<8x32xf32>, vector<8x32xf32>, vector<8x32xf32>, vector<8x32xf32> -> vector<32x32xf32>
    %47 = arith.mulf %46, %3 : vector<32x32xf32>
    %48 = tpu.concatenate %45, %45, %45, %45 in 0 : vector<8x32xf32>, vector<8x32xf32>, vector<8x32xf32>, vector<8x32xf32> -> vector<32x32xf32>
    %49 = arith.mulf %48, %3 : vector<32x32xf32>
    %cst_24 = arith.constant dense<0.000000e+00> : vector<8x32xf32>
    %50 = tpu.matmul %43, %47, %cst_24 {dimension_numbers = #tpu.dot_dimension_numbers<[1], [1], [0], [0], [0, 0, 1, 0], [], []>} : vector<8x32xf32>, vector<32x32xf32>, vector<8x32xf32> -> vector<8x32xf32>
    %cst_25 = arith.constant 0.353553385 : f32
    %51 = vector.broadcast %cst_25 : f32 to vector<8x32xf32>
    %52 = arith.mulf %50, %51 : vector<8x32xf32>
    %53 = arith.addf %52, %6 : vector<8x32xf32>
    %cst_26 = arith.constant dense<0xFF800000> : vector<8xf32>
    %54 = vector.multi_reduction <maximumf>, %53, %cst_26 [1] : vector<8x32xf32> to vector<8xf32>
    %55 = vector.shape_cast %54 : vector<8xf32> to vector<8x1xf32>
    %56 = vector.broadcast %55 : vector<8x1xf32> to vector<8x32xf32>
    %57 = arith.subf %53, %56 : vector<8x32xf32>
    %58 = math.exp %57 : vector<8x32xf32>
    %cst_27 = arith.constant dense<0.000000e+00> : vector<8x32xf32>
    %59 = tpu.matmul %58, %49, %cst_27 {dimension_numbers = #tpu.dot_dimension_numbers<[1], [0], [0], [1], [0, 0, 1, 1], [], []>} : vector<8x32xf32>, vector<32x32xf32>, vector<8x32xf32> -> vector<8x32xf32>
    %cst_28 = arith.constant dense<0.000000e+00> : vector<8x32xf32>
    %60 = tpu.matmul %58, %3, %cst_28 {dimension_numbers = #tpu.dot_dimension_numbers<[1], [0], [0], [1], [0, 0, 1, 1], [], []>} : vector<8x32xf32>, vector<32x32xf32>, vector<8x32xf32> -> vector<8x32xf32>
    %61 = tpu.reciprocal %60 {approx = true} : vector<8x32xf32> -> vector<8x32xf32>
    %62 = arith.mulf %59, %61 : vector<8x32xf32>
    %c0_29 = arith.constant 0 : index
    %c896 = arith.constant 896 : index
    %63 = vector.load %arg1[%c0_29, %c896] : memref<48x1280xf32, #tpu.memory_space<vmem>>, vector<32x32xf32>
    %cst_30 = arith.constant dense<0.000000e+00> : vector<8x32xf32>
    %64 = tpu.matmul %62, %63, %cst_30 {dimension_numbers = #tpu.dot_dimension_numbers<[1], [0], [0], [1], [0, 0, 1, 1], [], []>} : vector<8x32xf32>, vector<32x32xf32>, vector<8x32xf32> -> vector<8x32xf32>
    %c35 = arith.constant 35 : index
    %c896_31 = arith.constant 896 : index
    %65 = vector.load %arg1[%c35, %c896_31] : memref<48x1280xf32, #tpu.memory_space<vmem>>, vector<1x32xf32>
    %66 = vector.broadcast %65 : vector<1x32xf32> to vector<8x32xf32>
    %67 = arith.addf %64, %66 : vector<8x32xf32>
    %cst_32 = arith.constant dense<0.000000e+00> : vector<32x32xf32>
    %68 = tpu.matmul %4, %67, %cst_32 {dimension_numbers = #tpu.dot_dimension_numbers<[1], [0], [0], [1], [0, 0, 1, 1], [], []>} : vector<32x8xf32>, vector<8x32xf32>, vector<32x32xf32> -> vector<32x32xf32>
    %69 = arith.addf %36, %68 : vector<32x32xf32>
    %70 = arith.addf %69, %0 : vector<32x32xf32>
    %c38 = arith.constant 38 : index
    %c0_33 = arith.constant 0 : index
    %71 = vector.load %arg1[%c38, %c0_33] : memref<48x1280xf32, #tpu.memory_space<vmem>>, vector<1x32xf32>
    %c39 = arith.constant 39 : index
    %c0_34 = arith.constant 0 : index
    %72 = vector.load %arg1[%c39, %c0_34] : memref<48x1280xf32, #tpu.memory_space<vmem>>, vector<1x32xf32>
    %cst_35 = arith.constant dense<0.000000e+00> : vector<32xf32>
    %73 = vector.multi_reduction <add>, %70, %cst_35 [1] : vector<32x32xf32> to vector<32xf32>
    %74 = vector.shape_cast %73 : vector<32xf32> to vector<32x1xf32>
    %cst_36 = arith.constant 3.200000e+01 : f32
    %75 = vector.broadcast %cst_36 : f32 to vector<32x1xf32>
    %76 = arith.divf %74, %75 : vector<32x1xf32>
    %77 = vector.broadcast %76 : vector<32x1xf32> to vector<32x32xf32>
    %78 = arith.subf %70, %77 : vector<32x32xf32>
    %79 = arith.mulf %78, %78 : vector<32x32xf32>
    %cst_37 = arith.constant dense<0.000000e+00> : vector<32xf32>
    %80 = vector.multi_reduction <add>, %79, %cst_37 [1] : vector<32x32xf32> to vector<32xf32>
    %81 = vector.shape_cast %80 : vector<32xf32> to vector<32x1xf32>
    %cst_38 = arith.constant 3.200000e+01 : f32
    %82 = vector.broadcast %cst_38 : f32 to vector<32x1xf32>
    %83 = arith.divf %81, %82 : vector<32x1xf32>
    %84 = vector.broadcast %76 : vector<32x1xf32> to vector<32x32xf32>
    %85 = arith.subf %70, %84 : vector<32x32xf32>
    %cst_39 = arith.constant 9.99999974E-6 : f32
    %86 = vector.broadcast %cst_39 : f32 to vector<32x1xf32>
    %87 = arith.addf %83, %86 : vector<32x1xf32>
    %88 = math.rsqrt %87 : vector<32x1xf32>
    %89 = vector.broadcast %88 : vector<32x1xf32> to vector<32x32xf32>
    %90 = arith.mulf %85, %89 : vector<32x32xf32>
    %91 = vector.broadcast %71 : vector<1x32xf32> to vector<32x32xf32>
    %92 = arith.mulf %90, %91 : vector<32x32xf32>
    %93 = vector.broadcast %72 : vector<1x32xf32> to vector<32x32xf32>
    %94 = arith.addf %92, %93 : vector<32x32xf32>
    %c0_40 = arith.constant 0 : index
    %c1024 = arith.constant 1024 : index
    %95 = vector.load %arg1[%c0_40, %c1024] : memref<48x1280xf32, #tpu.memory_space<vmem>>, vector<32x64xf32>
    %cst_41 = arith.constant dense<0.000000e+00> : vector<32x64xf32>
    %96 = tpu.matmul %94, %95, %cst_41 {dimension_numbers = #tpu.dot_dimension_numbers<[1], [0], [0], [1], [0, 0, 1, 1], [], []>} : vector<32x32xf32>, vector<32x64xf32>, vector<32x64xf32> -> vector<32x64xf32>
    %c36 = arith.constant 36 : index
    %c1024_42 = arith.constant 1024 : index
    %97 = vector.load %arg1[%c36, %c1024_42] : memref<48x1280xf32, #tpu.memory_space<vmem>>, vector<1x64xf32>
    %98 = vector.broadcast %97 : vector<1x64xf32> to vector<32x64xf32>
    %99 = arith.addf %96, %98 : vector<32x64xf32>
    %cst_43 = arith.constant 5.000000e-01 : f32
    %100 = vector.broadcast %cst_43 : f32 to vector<32x64xf32>
    %101 = arith.mulf %100, %99 : vector<32x64xf32>
    %102 = arith.mulf %99, %99 : vector<32x64xf32>
    %103 = arith.mulf %102, %99 : vector<32x64xf32>
    %cst_44 = arith.constant 4.471500e-02 : f32
    %104 = vector.broadcast %cst_44 : f32 to vector<32x64xf32>
    %105 = arith.mulf %104, %103 : vector<32x64xf32>
    %106 = arith.addf %99, %105 : vector<32x64xf32>
    %cst_45 = arith.constant 0.797884583 : f32
    %107 = vector.broadcast %cst_45 : f32 to vector<32x64xf32>
    %108 = arith.mulf %107, %106 : vector<32x64xf32>
    %109 = math.tanh %108 : vector<32x64xf32>
    %cst_46 = arith.constant 1.000000e+00 : f32
    %110 = vector.broadcast %cst_46 : f32 to vector<32x64xf32>
    %111 = arith.addf %110, %109 : vector<32x64xf32>
    %112 = arith.mulf %101, %111 : vector<32x64xf32>
    %c0_47 = arith.constant 0 : index
    %c1152 = arith.constant 1152 : index
    %113 = vector.load %arg1[%c0_47, %c1152] : memref<48x1280xf32, #tpu.memory_space<vmem>>, vector<32x64xf32>
    %cst_48 = arith.constant dense<0.000000e+00> : vector<32x32xf32>
    %114 = tpu.matmul %112, %113, %cst_48 {dimension_numbers = #tpu.dot_dimension_numbers<[1], [1], [0], [0], [0, 0, 1, 0], [], []>} : vector<32x64xf32>, vector<32x64xf32>, vector<32x32xf32> -> vector<32x32xf32>
    %c37 = arith.constant 37 : index
    %c1152_49 = arith.constant 1152 : index
    %115 = vector.load %arg1[%c37, %c1152_49] : memref<48x1280xf32, #tpu.memory_space<vmem>>, vector<1x32xf32>
    %116 = vector.broadcast %115 : vector<1x32xf32> to vector<32x32xf32>
    %117 = arith.addf %114, %116 : vector<32x32xf32>
    %118 = arith.addf %117, %94 : vector<32x32xf32>
    %c40 = arith.constant 40 : index
    %c0_50 = arith.constant 0 : index
    %119 = vector.load %arg1[%c40, %c0_50] : memref<48x1280xf32, #tpu.memory_space<vmem>>, vector<1x32xf32>
    %c41 = arith.constant 41 : index
    %c0_51 = arith.constant 0 : index
    %120 = vector.load %arg1[%c41, %c0_51] : memref<48x1280xf32, #tpu.memory_space<vmem>>, vector<1x32xf32>
    %cst_52 = arith.constant dense<0.000000e+00> : vector<32xf32>
    %121 = vector.multi_reduction <add>, %118, %cst_52 [1] : vector<32x32xf32> to vector<32xf32>
    %122 = vector.shape_cast %121 : vector<32xf32> to vector<32x1xf32>
    %cst_53 = arith.constant 3.200000e+01 : f32
    %123 = vector.broadcast %cst_53 : f32 to vector<32x1xf32>
    %124 = arith.divf %122, %123 : vector<32x1xf32>
    %125 = vector.broadcast %124 : vector<32x1xf32> to vector<32x32xf32>
    %126 = arith.subf %118, %125 : vector<32x32xf32>
    %127 = arith.mulf %126, %126 : vector<32x32xf32>
    %cst_54 = arith.constant dense<0.000000e+00> : vector<32xf32>
    %128 = vector.multi_reduction <add>, %127, %cst_54 [1] : vector<32x32xf32> to vector<32xf32>
    %129 = vector.shape_cast %128 : vector<32xf32> to vector<32x1xf32>
    %cst_55 = arith.constant 3.200000e+01 : f32
    %130 = vector.broadcast %cst_55 : f32 to vector<32x1xf32>
    %131 = arith.divf %129, %130 : vector<32x1xf32>
    %132 = vector.broadcast %124 : vector<32x1xf32> to vector<32x32xf32>
    %133 = arith.subf %118, %132 : vector<32x32xf32>
    %cst_56 = arith.constant 9.99999974E-6 : f32
    %134 = vector.broadcast %cst_56 : f32 to vector<32x1xf32>
    %135 = arith.addf %131, %134 : vector<32x1xf32>
    %136 = math.rsqrt %135 : vector<32x1xf32>
    %137 = vector.broadcast %136 : vector<32x1xf32> to vector<32x32xf32>
    %138 = arith.mulf %133, %137 : vector<32x32xf32>
    %139 = vector.broadcast %119 : vector<1x32xf32> to vector<32x32xf32>
    %140 = arith.mulf %138, %139 : vector<32x32xf32>
    %141 = vector.broadcast %120 : vector<1x32xf32> to vector<32x32xf32>
    %142 = arith.addf %140, %141 : vector<32x32xf32>
    %c0_57 = arith.constant 0 : index
    %c0_58 = arith.constant 0 : index
    %143 = vector.load %arg3[%c0_57, %c0_58] : memref<32x32xf32, #tpu.memory_space<vmem>>, vector<32x32xf32>
    tpu.vector_store %arg3[%c0_57, %c0_58], %142 {strides = array<i32>} : memref<32x32xf32, #tpu.memory_space<vmem>>, vector<32x32xf32>,
    return
  }
}

</mosaic_0001>

<bundles_post_ra>
// kernel: enhanced_transformer_block.1
= control target key start
LH: loop header
LB: loop body
LE: loop exit
PB: predicated region body
PF: predicated region fallthrough
CT: control target
= control target key end

     0   :  { %8 = vsyncpa [#allocation3], 0  ;;  %s2939_s0 = inlined_call_operand.vmem [shape: f32[32,32], index: 0, kind: input, shape index: {}]   ;;  %s2940_s1 = inlined_call_operand.hbm [shape: f32[48,1280], index: 1, kind: input, shape index: {}]   ;;  %s2941_s2 = inlined_call_operand.hbm [shape: f32[128,256], index: 2, kind: input, shape index: {}]   ;;  %s2942_s3 = inlined_call_operand.vmem [shape: f32[32,32], index: 3, kind: output, shape index: {}]  }
   0x1   :  { %9 = vsyncpa [#allocation5], 0  ;;  %s2580_s12 = smov [#allocation2]   ;;  %s2532_s16 = scalar_lea.hbm %s2940_s1, 7680 }
   0x2   :  { %s17_s13 = sshll.u32 %s2580_s12, 4  ;;  %p2533_p0 = scmp.ne.s32.totalorder %s2940_s1, %s2532_s16  ;;  %s18_s13 = int_to_ptr.vmem [resolvable:$true] %s17_s13 }
   0x3   :  { %p2536_p1 = scmp.lt.u32.totalorder %s2532_s16, %s2940_s1 }
   0x5   :  { %p2538_p2 = pnand %p2536_p1, %p2533_p0 }
   0x7   :  { %2541 = shalt.err (!%p2538_p2)
}
   0x8   :  { %s2542_s21 = scalar_lea.vmem %s18_s13, 7680  ;;  %p2547_p4 = scmp.lt.s32.totalorder %s18_s13, %s18_s13 }
   0x9   :  { %p2543_p3 = scmp.ne.s32.totalorder %s18_s13, %s2542_s21  ;;  %p2548_p5 = scmp.lt.s32.totalorder %s2542_s21, %s2542_s21 }
   0xb   :  { %p2549_p6 = por %p2548_p5, %p2547_p4 }
   0xd   :  { %p2550_p7 = pnand %p2549_p6, %p2543_p3 }
   0xf   :  { %2553 = shalt.err (!%p2550_p7)
}
  0x10   :  { %s2581_s22 = smov 1280   ;;  %s2582_s23 = smov 80  }
  0x11   :  { %23 = dma.hbm_to_vmem [thread:$0]  %s2940_s1, 7680, %s18_s13, [#allocation3], %s2581_s22, %s2581_s22, %s2582_s23  }
  0x12   :  { %s2583_s26 = smov [#allocation4]   ;;  %s2554_s30 = scalar_lea.hbm %s2941_s2, 4096 }
  0x13   :  { %s29_s27 = sshll.u32 %s2583_s26, 4  ;;  %p2555_p8 = scmp.ne.s32.totalorder %s2941_s2, %s2554_s30  ;;  %s30_s27 = int_to_ptr.vmem [resolvable:$true] %s29_s27 }
  0x14   :  { %p2558_p9 = scmp.lt.u32.totalorder %s2554_s30, %s2941_s2 }
  0x16   :  { %p2560_p10 = pnand %p2558_p9, %p2555_p8 }
  0x18   :  { %2563 = shalt.err (!%p2560_p10)
}
  0x19   :  { %s2564_s8 = scalar_lea.vmem %s30_s27, 4096  ;;  %p2569_p12 = scmp.lt.s32.totalorder %s30_s27, %s30_s27 }
  0x1a   :  { %p2565_p11 = scmp.ne.s32.totalorder %s30_s27, %s2564_s8  ;;  %p2570_p13 = scmp.lt.s32.totalorder %s2564_s8, %s2564_s8 }
  0x1c   :  { %p2571_p0 = por %p2570_p13, %p2569_p12 }
  0x1e   :  { %p2572_p1 = pnand %p2571_p0, %p2565_p11 }
  0x20   :  { %2575 = shalt.err (!%p2572_p1)
}
  0x21   :  { %s2584_s1 = smov 256   ;;  %s2585_s9 = smov 16  }
  0x22   :  { %35 = dma.hbm_to_vmem [thread:$0]  %s2941_s2, 4096, %s30_s27, [#allocation5], %s2584_s1, %s2584_s1, %s2585_s9  }
  0x23   :  { %2576 = dma.done.wait [#allocation3], 7680  }
  0x24   :  { %2577 = vsyncadd [#allocation3], 4294959616 }
  0x25   :  { %2578 = dma.done.wait [#allocation5], 4096  }
  0x26   :  { %2579 = vsyncadd [#allocation5], 4294963200  ;;  %v2586_v0 = vmov 0.0   ;;  %v77_v1 = vld [vmem:[#allocation2 + $0x8] sm:$0xff]  ;;  %v80_v2 = vld [vmem:[#allocation2 + $0x58] sm:$0xff]  ;;  %vm106_vm0 = vcmask 261120   ;;  %v91_v23 = vlaneseq }
  0x27   :  { %183 = vmatprep.mubr.f32.mxu0 %v2586_v0  ;;  %v76_v3 = vld [vmem:[#allocation2] sm:$0xff]  ;;  %v2277_v4 = vpack.c.bf16 %v80_v2, %v77_v1  ;;  %v79_v5 = vld [vmem:[#allocation2 + $0x50] sm:$0xff]  ;;  %v83_v6 = vld [vmem:[#allocation2 + $0xa8] sm:$0xff]  ;;  %vm2588_vm2 = vmmov 0   ;;  %vm1349_vm3 = vcmask 64512   ;;  %vm1661_vm4 = vcmask 523264  }
  0x28   :  { %v86_v7 = vld [vmem:[#allocation2 + $0xf8] sm:$0xff]  ;;  %v2279_v8 = vpack.c.bf16 %v79_v5, %v76_v3  ;;  %v82_v10 = vld [vmem:[#allocation2 + $0xa0] sm:$0xff]  ;;  %v85_v11 = vld [vmem:[#allocation2 + $0xf0] sm:$0xff]  ;;  %v2673_v24 = vshrl.u32 %v91_v23, 7 }
  0x29   :  { %v2281_v9 = vpack.c.bf16 %v86_v7, %v83_v6  ;;  %v2637_v12 = vld [vmem:[%s2939_s0] sm:$0xff]  ;;  %2278 = vmatprep.subr.bf16.mxu0 %v2277_v4  ;;  %v2283_v13 = vpack.c.bf16 %v85_v11, %v82_v10  ;;  %v2647_v14 = vld [vmem:[%s2939_s0 + $0x8] sm:$0xff]  ;;  %v2655_v15 = vld [vmem:[%s2939_s0 + $0x10] sm:$0xff] }
  0x2a   :  { %2041 = vmatprep.mubr.msk.f32.mxu1 %vm106_vm0, %v2637_v12  ;;  %2280 = vmatpush1.bf16.msra.mxu0 %v2279_v8  ;;  %v2663_v16 = vld [vmem:[%s2939_s0 + $0x18] sm:$0xff]  ;;  %v78_v17 = vld [vmem:[#allocation2 + $0x10] sm:$0xff]  ;;  %v81_v18 = vld [vmem:[#allocation2 + $0x60] sm:$0xff]  ;;  %v93_v25 = vsub.s32 0, %v2673_v24  ;;  %v97_v27 = vsub.s32 1, %v2673_v24 }
  0x2b   :  { %2282 = vmatprep.subr.bf16.mxu0 %v2281_v9  ;;  %v84_v19 = vld [vmem:[#allocation2 + $0xb0] sm:$0xff]  ;;  %v2285_v20 = vpack.c.bf16 %v81_v18, %v78_v17  ;;  %v87_v21 = vld [vmem:[#allocation2 + $0x100] sm:$0xff]  ;;  %vm2714_vm1 = vmpackc.low %vm106_vm0, %vm106_vm0 }
  0x2c   :  { %v2289_v22 = vpack.c.bf16 %v87_v21, %v84_v19  ;;  %v2676_v26 = vld [vmem:[#allocation2 + $0x140] ss:$8 sm:$0x7]  ;;  %vm2468_vm5 = vmpackc.low %vm1661_vm4, %vm1661_vm4 }
  0x2d   :  { %2286 = vmatprep.subr.bf16.mxu1 %v2285_v20  ;;  %v94_v28 = vrot.slane %v2676_v26, %v93_v25  ;;  %v98_v29 = vrot.slane %v2676_v26, %v97_v27  ;;  %v2685_v33 = vld [vmem:[#allocation4] sm:$0xff]  ;;  %v2692_v38 = vld [vmem:[#allocation4 + $0x10] sm:$0xff] }
  0x2e   :  { %2284 = vmatpush1.bf16.msra.mxu0 %v2283_v13  ;;  %2288 = vmatpush3.bf16.msra.mxu1 %v2285_v20  ;;  %v2688_v35 = vld [vmem:[#allocation4 + $0x40] sm:$0xff]  ;;  %v2696_v40 = vld [vmem:[#allocation4 + $0x50] sm:$0xff] }
  0x2f   :  { %2290 = vmatprep.subr.bf16.mxu1 %v2289_v22  ;;  %v2690_v36 = vld [vmem:[#allocation4 + $0x80] sm:$0xff]  ;;  %v2698_v41 = vld [vmem:[#allocation4 + $0x90] sm:$0xff] }
  0x30   :  { %v2700_v42 = vld [vmem:[#allocation4 + $0xd0] sm:$0xff]  ;;  %v2702_v44 = vld [vmem:[#allocation4 + $0xc0] sm:$0xff] }
  0x31   :  { %1847 = vmatmul.mubr.msk.f32.vlgmr.msra.gmra.mrb[0].mxu0 %vm106_vm0, %v2637_v12  ;;  %v2718_v61 = vld [vmem:[#allocation4 + $0x20] sm:$0xff]  ;;  %v2728_v5 = vld [vmem:[#allocation4 + $0x30] sm:$0xff] }
  0x32   :  { %189 = vmatprep.mubr.f32.mxu0 %v2586_v0  ;;  %2292 = vmatpush3.bf16.msra.mxu1 %v2289_v22  ;;  %v2720_v62 = vld [vmem:[#allocation4 + $0x60] sm:$0xff]  ;;  %v2730_v7 = vld [vmem:[#allocation4 + $0x70] sm:$0xff] }
  0x33   :  { %v2722_v2 = vld [vmem:[#allocation4 + $0xa0] sm:$0xff]  ;;  %v2732_v8 = vld [vmem:[#allocation4 + $0xb0] sm:$0xff] }
  0x34   :  { %v2724_v3 = vld [vmem:[#allocation4 + $0xe0] sm:$0xff]  ;;  %v2734_v9 = vld [vmem:[#allocation4 + $0xf0] sm:$0xff] }
  0x35   :  { %1848 = vmatmul.mubr.msk.f32.gmra.mrb[2].mxu0 %vm106_vm0, %v2647_v14  ;;  %2042 = vmatmul.mubr.msk.f32.vlgmr.msra.gmra.mrb[0].mxu1 %vm106_vm0, %v2647_v14 }
  0x36   :  { %195 = vmatprep.mubr.f32.mxu0 %v2586_v0  ;;  %2044 = vmatprep.mubr.msk.f32.mxu1 %vm106_vm0, %v2655_v15 }
  0x39   :  { %1849 = vmatmul.mubr.msk.f32.gmra.mrb[4].mxu0 %vm106_vm0, %v2655_v15  ;;  %2045 = vmatmul.mubr.msk.f32.gmra.mrb[2].mxu1 %vm106_vm0, %v2663_v16 }
  0x3a   :  { %201 = vmatprep.mubr.f32.mxu0 %v2586_v0 }
  0x3d   :  { %1850 = vmatmul.mubr.msk.f32.gmra.mrb[6].mxu0 %vm106_vm0, %v2663_v16 }
 0x104   :  { %v185_v30 = vpop.f32.mrb[0].mxu0 }
 0x105   :  { %v186_v31 = vadd.f32 %v185_v30, %v94_v28  ;;  %v187_v32 = vpop.f32.mrb[1].mxu0 }
 0x106   :  { %v188_v34 = vadd.f32 %v187_v32, %v98_v29  ;;  %v101_v32 = vsub.s32 2, %v2673_v24 }
 0x107   :  { %2079 = vmatprep.mubr.msk.f32.mxu0 %vm106_vm0, %v186_v31 }
 0x108   :  { %v191_v37 = vpop.f32.mrb[2].mxu0  ;;  %v293_v46 = vmul.f32 %v188_v34, %v2685_v33  ;;  %v297_v47 = vmul.f32 %v188_v34, %v2688_v35  ;;  %v301_v48 = vmul.f32 %v188_v34, %v2690_v36  ;;  %v305_v54 = vmul.f32 %v188_v34, %v2702_v44  ;;  %v2043_v34 = vpop.f32.mrb[0].mxu1 }
 0x109   :  { %v2694_v39 = vadd.f32 %v191_v37, %v94_v28  ;;  %v193_v43 = vpop.f32.mrb[3].mxu0  ;;  %v102_v37 = vrot.slane %v2676_v26, %v101_v32 }
 0x10a   :  { %v194_v45 = vadd.f32 %v193_v43, %v98_v29  ;;  %v274_v43 = vpop.f32.mrb[1].mxu1 }
 0x10c   :  { %v294_v49 = vmul.f32 %v194_v45, %v2692_v38  ;;  %v298_v50 = vmul.f32 %v194_v45, %v2696_v40  ;;  %v302_v51 = vmul.f32 %v194_v45, %v2698_v41  ;;  %v306_v52 = vmul.f32 %v194_v45, %v2700_v42  ;;  %v197_v53 = vpop.f32.mrb[4].mxu0 }
 0x10d   :  { %v198_v55 = vadd.f32 %v197_v53, %v94_v28  ;;  %v199_v56 = vpop.f32.mrb[5].mxu0  ;;  %v280_v45 = vadd.f32 %v2043_v34, %v102_v37 }
 0x10e   :  { %v2293_v58 = vpack.c.bf16 %v294_v49, %v293_v46  ;;  %v2305_v59 = vpack.c.bf16 %v298_v50, %v297_v47  ;;  %v2317_v60 = vpack.c.bf16 %v302_v51, %v301_v48  ;;  %v200_v63 = vadd.f32 %v199_v56, %v98_v29  ;;  %v2046_v47 = vpop.f32.mrb[2].mxu1 }
 0x10f   :  { %v2329_v1 = vpack.c.bf16 %v306_v52, %v305_v54  ;;  %v275_v46 = vadd.f32 %v274_v43, %v102_v37  ;;  %v290_v48 = vadd.f32 %v2046_v47, %v102_v37  ;;  %v284_v49 = vpop.f32.mrb[3].mxu1  ;;  %v310_v50 = vmul.f32 %v280_v45, %v2692_v38 }
 0x110   :  { %v203_v4 = vpop.f32.mrb[6].mxu0  ;;  %2295 = vmatprep.subr.msk.bf16.mxu0 %vm2714_vm1, %v2293_v58  ;;  %v295_v13 = vmul.f32 %v200_v63, %v2718_v61  ;;  %v299_v17 = vmul.f32 %v200_v63, %v2720_v62  ;;  %v303_v18 = vmul.f32 %v200_v63, %v2722_v2  ;;  %v307_v19 = vmul.f32 %v200_v63, %v2724_v3 }
 0x111   :  { %v204_v6 = vadd.f32 %v203_v4, %v94_v28  ;;  %v205_v10 = vpop.f32.mrb[7].mxu0  ;;  %2298 = vmatpush3.bf16.xpose.msk.msra.mxu0 %vm2714_vm1, %v2293_v58  ;;  %v313_v51 = vmul.f32 %v275_v46, %v2688_v35  ;;  %v285_v52 = vadd.f32 %v284_v49, %v102_v37  ;;  %v314_v53 = vmul.f32 %v280_v45, %v2696_v40 }
 0x112   :  { %v206_v11 = vadd.f32 %v205_v10, %v98_v29  ;;  %v317_v54 = vmul.f32 %v275_v46, %v2690_v36  ;;  %v312_v56 = vmul.f32 %v290_v48, %v2728_v5  ;;  %v316_v58 = vmul.f32 %v290_v48, %v2730_v7 }
 0x113   :  { %v2349_v63 = vpack.c.bf16 %v314_v53, %v313_v51  ;;  %v321_v10 = vmul.f32 %v275_v46, %v2702_v44 }
 0x114   :  { %v296_v20 = vmul.f32 %v206_v11, %v2728_v5  ;;  %v300_v21 = vmul.f32 %v206_v11, %v2730_v7  ;;  %v304_v22 = vmul.f32 %v206_v11, %v2732_v8  ;;  %v308_v23 = vmul.f32 %v206_v11, %v2734_v9 }
 0x115   :  { %v322_v11 = vmul.f32 %v280_v45, %v2700_v42 }
 0x116   :  { %v2299_v28 = vpack.c.bf16 %v296_v20, %v295_v13  ;;  %v2311_v30 = vpack.c.bf16 %v300_v21, %v299_v17  ;;  %v2323_v31 = vpack.c.bf16 %v304_v22, %v303_v18  ;;  %v2335_v29 = vpack.c.bf16 %v308_v23, %v307_v19 }
 0x117   :  { %v323_v13 = vmul.f32 %v285_v52, %v2724_v3  ;;  %v324_v19 = vmul.f32 %v290_v48, %v2734_v9  ;;  %v2365_v21 = vpack.c.bf16 %v322_v11, %v321_v10 }
 0x118   :  { %2301 = vmatprep.subr.msk.bf16.mxu0 %vm2714_vm1, %v2299_v28 }
 0x119   :  { %2304 = vmatpush3.bf16.xpose.msk.msra.mxu0 %vm2714_vm1, %v2299_v28  ;;  %v2369_v22 = vpack.c.bf16 %v324_v19, %v323_v13  ;;  %v2381_v13 = vpack.c.bf16 %v2696_v40, %v2688_v35  ;;  %v2397_v35 = vpack.c.bf16 %v2700_v42, %v2702_v44  ;;  %v2401_v40 = vpack.c.bf16 %v2734_v9, %v2724_v3 }
 0x11a   :  { %2307 = vmatprep.subr.msk.bf16.mxu0 %vm2714_vm1, %v2305_v59 }
 0x121   :  { %2310 = vmatpush3.bf16.xpose.msk.msra.mxu0 %vm2714_vm1, %v2305_v59  ;;  %v320_v59 = vmul.f32 %v290_v48, %v2732_v8 }
 0x122   :  { %2313 = vmatprep.subr.msk.bf16.mxu0 %vm2714_vm1, %v2311_v30 }
 0x129   :  { %2316 = vmatpush3.bf16.xpose.msk.msra.mxu0 %vm2714_vm1, %v2311_v30  ;;  %v62_v30 = vld [vmem:[#allocation4 + $0x8] sm:$0xff] }
 0x12a   :  { %2319 = vmatprep.subr.msk.bf16.mxu0 %vm2714_vm1, %v2317_v60 }
 0x131   :  { %2322 = vmatpush3.bf16.xpose.msk.msra.mxu0 %vm2714_vm1, %v2317_v60  ;;  %v311_v60 = vmul.f32 %v285_v52, %v2718_v61 }
 0x132   :  { %2325 = vmatprep.subr.msk.bf16.mxu0 %vm2714_vm1, %v2323_v31 }
 0x133   :  { %v2345_v17 = vpack.c.bf16 %v312_v56, %v311_v60 }
 0x139   :  { %2328 = vmatpush3.bf16.xpose.msk.msra.mxu0 %vm2714_vm1, %v2323_v31 }
 0x13a   :  { %2331 = vmatprep.subr.msk.bf16.mxu0 %vm2714_vm1, %v2329_v1 }
 0x141   :  { %2334 = vmatpush3.bf16.xpose.msk.msra.mxu0 %vm2714_vm1, %v2329_v1  ;;  %v315_v1 = vmul.f32 %v285_v52, %v2720_v62 }
 0x142   :  { %2337 = vmatprep.subr.msk.bf16.mxu0 %vm2714_vm1, %v2335_v29 }
 0x143   :  { %v2353_v18 = vpack.c.bf16 %v316_v58, %v315_v1 }
 0x149   :  { %2340 = vmatpush3.bf16.xpose.msk.msra.mxu0 %vm2714_vm1, %v2335_v29 }
 0x150   :  { %2080 = vmatmul.mubr.msk.f32.vlgmr.msra.gmra.mrb[8].mxu0 %vm106_vm0, %v2694_v39  ;;  %v309_v39 = vmul.f32 %v275_v46, %v2685_v33  ;;  %v64_v46 = vld [vmem:[#allocation4 + $0x28] sm:$0xff] }
 0x151   :  { %2082 = vmatprep.mubr.msk.f32.mxu0 %vm106_vm0, %v198_v55  ;;  %v318_v55 = vmul.f32 %v280_v45, %v2698_v41  ;;  %v63_v45 = vld [vmem:[#allocation4 + $0x18] sm:$0xff] }
 0x152   :  { %v2341_v26 = vpack.c.bf16 %v310_v50, %v309_v39  ;;  %v65_v50 = vld [vmem:[#allocation4 + $0x38] sm:$0xff] }
 0x153   :  { %v2357_v4 = vpack.c.bf16 %v318_v55, %v317_v54 }
 0x154   :  { %2083 = vmatmul.mubr.msk.f32.gmra.mrb[10].mxu0 %vm106_vm0, %v204_v6  ;;  %2342 = vmatprep.subr.bf16.mxu1 %v2341_v26  ;;  %v319_v6 = vmul.f32 %v285_v52, %v2722_v2  ;;  %v2373_v52 = vpack.c.bf16 %v2692_v38, %v2685_v33  ;;  %v2377_v33 = vpack.c.bf16 %v2728_v5, %v2718_v61 }
 0x155   :  { %948 = vmatprep.mubr.f32.mxu0 %v2586_v0  ;;  %2344 = vmatpush3.bf16.msra.mxu1 %v2341_v26  ;;  %v2389_v61 = vpack.c.bf16 %v2698_v41, %v2690_v36  ;;  %v2393_v5 = vpack.c.bf16 %v2732_v8, %v2722_v2  ;;  %v676_v36 = vld [vmem:[#allocation2 + $0x18] sm:$0xff]  ;;  %v677_v41 = vld [vmem:[#allocation2 + $0x68] sm:$0xff] }
 0x156   :  { %v2361_v20 = vpack.c.bf16 %v320_v59, %v319_v6  ;;  %2346 = vmatprep.subr.bf16.mxu1 %v2345_v17  ;;  %v678_v2 = vld [vmem:[#allocation2 + $0xb8] sm:$0xff] }
 0x159   :  { %2348 = vmatpush3.bf16.msra.mxu1 %v2345_v17 }
 0x15a   :  { %2350 = vmatprep.subr.bf16.mxu1 %v2349_v63 }
 0x15d   :  { %2352 = vmatpush3.bf16.msra.mxu1 %v2349_v63 }
 0x15e   :  { %2354 = vmatprep.subr.bf16.mxu1 %v2353_v18 }
 0x161   :  { %2356 = vmatpush3.bf16.msra.mxu1 %v2353_v18  ;;  %v2385_v18 = vpack.c.bf16 %v2730_v7, %v2720_v62  ;;  %v2405_v62 = vpack.c.bf16 %v677_v41, %v676_v36  ;;  %v679_v7 = vld [vmem:[#allocation2 + $0x108] sm:$0xff] }
 0x162   :  { %2358 = vmatprep.subr.bf16.mxu1 %v2357_v4  ;;  %v2409_v8 = vpack.c.bf16 %v679_v7, %v678_v2  ;;  %v864_v41 = vld [vmem:[#allocation2 + $0x162] ss:$8 sm:$0x7] }
 0x163   :  { %v873_v2 = vrot.slane %v864_v41, %v97_v27 }
 0x165   :  { %2360 = vmatpush3.bf16.msra.mxu1 %v2357_v4 }
 0x166   :  { %2362 = vmatprep.subr.bf16.mxu1 %v2361_v20 }
 0x169   :  { %2364 = vmatpush3.bf16.msra.mxu1 %v2361_v20 }
 0x16a   :  { %2366 = vmatprep.subr.bf16.mxu1 %v2365_v21 }
 0x16d   :  { %2368 = vmatpush3.bf16.msra.mxu1 %v2365_v21 }
 0x16e   :  { %2370 = vmatprep.subr.bf16.mxu1 %v2369_v22 }
 0x171   :  { %2372 = vmatpush3.bf16.msra.mxu1 %v2369_v22 }
 0x172   :  { %2374 = vmatprep.subr.bf16.mxu1 %v2373_v52 }
 0x223   :  { %v2081_v23 = vpop.f32.mrb[8].mxu0 }
 0x224   :  { %v451_v28 = vpop.f32.mrb[9].mxu0  ;;  %v471_v29 = vmul.f32 0.35355338, %v2081_v23 }
 0x225   :  { %v470_v31 = vmul.f32 0.35355338, %v451_v28 }
 0x226   :  { %v475_v49 = vadd.f32 %v471_v29, %v63_v45  ;;  %v2587_v45 = vmov 0.0|0.0  }
 0x227   :  { %v2084_v34 = vpop.f32.mrb[10].mxu0  ;;  %v474_v37 = vadd.f32 %v470_v31, %v62_v30 }
 0x228   :  { %v461_v43 = vpop.f32.mrb[11].mxu0  ;;  %v473_v48 = vmul.f32 0.35355338, %v2084_v34 }
 0x229   :  { %v472_v47 = vmul.f32 0.35355338, %v461_v43  ;;  %478 = vmax.xlane.f32.xlu0 %v474_v37 }
 0x22a   :  { %v477_v51 = vadd.f32 %v473_v48, %v65_v50  ;;  %v851_v48 = vld [vmem:[#allocation2 + $0x20] sm:$0xff] }
 0x22b   :  { %v476_v39 = vadd.f32 %v472_v47, %v64_v46  ;;  %v852_v46 = vld [vmem:[#allocation2 + $0x28] sm:$0xff]  ;;  %v855_v47 = vld [vmem:[#allocation2 + $0x78] sm:$0xff] }
 0x22d   :  { %480 = vmax.xlane.f32.xlu0 %v475_v49  ;;  %482 = vmax.xlane.f32.xlu1 %v476_v39 }
 0x231   :  { %484 = vmax.xlane.f32.xlu1 %v477_v51 }
 0x2b6   :  { %v479_v53 = vpop.xlane.xlu0 %478 }
 0x2b7   :  { %v486_v54 = vsub.f32 %v474_v37, %v479_v53  ;;  %v857_v53 = vld [vmem:[#allocation2 + $0xc0] sm:$0xff] }
 0x2b9   :  { %v490_v55 = vmul.f32 1.442695, %v486_v54 }
 0x2ba   :  { %v481_v26 = vpop.xlane.xlu0 %480  ;;  %v483_v56 = vpop.xlane.xlu1 %482 }
 0x2bb   :  { %2488 = vpow2.f32 %v490_v55  ;;  %v487_v58 = vsub.f32 %v475_v49, %v481_v26  ;;  %v488_v59 = vsub.f32 %v476_v39, %v483_v56  ;;  %v2419_v49 = vpack.c.bf16 %v855_v47, %v852_v46  ;;  %v854_v39 = vld [vmem:[#allocation2 + $0x70] sm:$0xff]  ;;  %v680_v56 = vld [vmem:[#allocation2 + $0x159] ss:$0 sm:$0xff] }
 0x2bc   :  { %v2421_v50 = vpack.c.bf16 %v854_v39, %v851_v48  ;;  %v860_v55 = vld [vmem:[#allocation2 + $0x110] sm:$0xff]  ;;  %v869_v48 = vrot.slane %v864_v41, %v93_v25 }
 0x2bd   :  { %v492_v60 = vmul.f32 1.442695, %v487_v58  ;;  %v494_v63 = vmul.f32 1.442695, %v488_v59  ;;  %2420 = vmatprep.subr.bf16.mxu0 %v2419_v49  ;;  %v2425_v26 = vpack.c.bf16 %v860_v55, %v857_v53 }
 0x2be   :  { %v485_v1 = vpop.xlane.xlu1 %484  ;;  %2422 = vmatpush1.bf16.msra.mxu0 %v2421_v50  ;;  %v75_v50 = vld [vmem:[#allocation4 + $0xd8] sm:$0xff] }
 0x2bf   :  { %2490 = vpow2.f32 %v492_v60  ;;  %v489_v4 = vsub.f32 %v477_v51, %v485_v1  ;;  %v858_v51 = vld [vmem:[#allocation2 + $0xc8] sm:$0xff] }
 0x2c0   :  { %2492 = vpow2.f32 %v494_v63 }
 0x2c1   :  { %v496_v6 = vmul.f32 1.442695, %v489_v4 }
 0x2c3   :  { %2494 = vpow2.f32 %v496_v6 }
 0x2c5   :  { %v2489_v10 = vpop.eup %2488 }
 0x2c6   :  { %2117 = vmatprep.mubr.f32.mxu1 %v2489_v10 }
 0x2c9   :  { %v2491_v38 = vpop.eup %2490 }
 0x2ca   :  { %v2493_v11 = vpop.eup %2492  ;;  %2118 = vmatmul.mubr.f32.vlgmr.msra.gmra.mrb[4].mxu1 %v2491_v38 }
 0x2cb   :  { %2376 = vmatpush3.bf16.msra.mxu1 %v2373_v52  ;;  %2120 = vmatprep.mubr.f32.mxu1 %v2493_v11  ;;  %v861_v52 = vld [vmem:[#allocation2 + $0x118] sm:$0xff] }
 0x2cc   :  { %2378 = vmatprep.subr.bf16.mxu1 %v2377_v33  ;;  %v2423_v54 = vpack.c.bf16 %v861_v52, %v858_v51 }
 0x2cd   :  { %v2495_v17 = vpop.eup %2494 }
 0x2ce   :  { %2121 = vmatmul.mubr.f32.gmra.mrb[6].mxu1 %v2495_v17  ;;  %2424 = vmatprep.subr.bf16.mxu0 %v2423_v54 }
 0x2cf   :  { %2380 = vmatpush3.bf16.msra.mxu1 %v2377_v33  ;;  %2155 = vmatprep.mubr.f32.mxu1 %v2489_v10 }
 0x2d0   :  { %2382 = vmatprep.subr.bf16.mxu1 %v2381_v13  ;;  %2426 = vmatpush1.bf16.msra.mxu0 %v2425_v26 }
 0x2d1   :  { %2433 = vmatprep.subr.bf16.mxu0 %v2587_v45 }
 0x2d3   :  { %2384 = vmatpush3.bf16.msra.mxu1 %v2381_v13 }
 0x2d4   :  { %2386 = vmatprep.subr.bf16.mxu1 %v2385_v18 }
 0x2d7   :  { %2388 = vmatpush3.bf16.msra.mxu1 %v2385_v18 }
 0x2d8   :  { %2390 = vmatprep.subr.bf16.mxu1 %v2389_v61 }
 0x2db   :  { %2392 = vmatpush3.bf16.msra.mxu1 %v2389_v61  ;;  %v859_v61 = vld [vmem:[#allocation2 + $0xd0] sm:$0xff] }
 0x2dc   :  { %2394 = vmatprep.subr.bf16.mxu1 %v2393_v5 }
 0x2df   :  { %2396 = vmatpush3.bf16.msra.mxu1 %v2393_v5  ;;  %v862_v5 = vld [vmem:[#allocation2 + $0x120] sm:$0xff] }
 0x2e0   :  { %2398 = vmatprep.subr.bf16.mxu1 %v2397_v35 }
 0x2e3   :  { %2400 = vmatpush3.bf16.msra.mxu1 %v2397_v35  ;;  %v2431_v35 = vpack.c.bf16 %v862_v5, %v859_v61  ;;  %v70_v5 = vld [vmem:[#allocation4 + $0x88] sm:$0xff] }
 0x2e4   :  { %2402 = vmatprep.subr.bf16.mxu1 %v2401_v40 }
 0x2e7   :  { %2404 = vmatpush3.bf16.msra.mxu1 %v2401_v40 }
 0x2e8   :  { %2406 = vmatprep.subr.bf16.mxu1 %v2405_v62 }
 0x2ea   :  { %2156 = vmatmul.mubr.f32.vlgmr.msra.gmra.mrb[8].mxu1 %v2491_v38  ;;  %v853_v38 = vld [vmem:[#allocation2 + $0x30] sm:$0xff] }
 0x2eb   :  { %2158 = vmatprep.mubr.f32.mxu1 %v2493_v11  ;;  %2408 = vmatpush3.bf16.msra.mxu1 %v2405_v62  ;;  %v856_v11 = vld [vmem:[#allocation2 + $0x80] sm:$0xff]  ;;  %v877_v62 = vrot.slane %v864_v41, %v101_v32  ;;  %v71_v41 = vld [vmem:[#allocation4 + $0x98] sm:$0xff] }
 0x2ec   :  { %2410 = vmatprep.subr.bf16.mxu1 %v2409_v8  ;;  %v2428_v18 = vpack.c.bf16 %v856_v11, %v853_v38 }
 0x2ee   :  { %2159 = vmatmul.mubr.f32.gmra.mrb[10].mxu1 %v2495_v17  ;;  %v74_v17 = vld [vmem:[#allocation4 + $0xc8] sm:$0xff] }
 0x2ef   :  { %2412 = vmatpush3.bf16.msra.mxu1 %v2409_v8  ;;  %v66_v8 = vld [vmem:[#allocation4 + $0x48] sm:$0xff] }
 0x2f0   :  { %2413 = vmatprep.subr.bf16.mxu1 %v2587_v45 }
 0x39d   :  { %v2119_v42 = vpop.f32.mrb[4].mxu1 }
 0x39e   :  { %v564_v44 = vpop.f32.mrb[5].mxu1 }
 0x3a1   :  { %v2122_v19 = vpop.f32.mrb[6].mxu1 }
 0x3a2   :  { %v574_v3 = vpop.f32.mrb[7].mxu1 }
 0x3bd   :  { %v2157_v9 = vpop.f32.mrb[8].mxu1 }
 0x3be   :  { %2496 = vrcp.f32 %v2157_v9  ;;  %v649_v20 = vpop.f32.mrb[9].mxu1 }
 0x3bf   :  { %2498 = vrcp.f32 %v649_v20  ;;  %v68_v20 = vld [vmem:[#allocation4 + $0x68] sm:$0xff] }
 0x3c1   :  { %v2160_v21 = vpop.f32.mrb[10].mxu1 }
 0x3c2   :  { %2500 = vrcp.f32 %v2160_v21  ;;  %v659_v22 = vpop.f32.mrb[11].mxu1  ;;  %v69_v21 = vld [vmem:[#allocation4 + $0x78] sm:$0xff] }
 0x3c3   :  { %2502 = vrcp.f32 %v659_v22 }
 0x3c8   :  { %v2497_v23 = vpop.eup %2496 }
 0x3c9   :  { %v2499_v28 = vpop.eup %2498  ;;  %v673_v30 = vmul.f32 %v2497_v23, %v2119_v42  ;;  %v67_v42 = vld [vmem:[#allocation4 + $0x58] sm:$0xff] }
 0x3ca   :  { %v672_v31 = vmul.f32 %v2499_v28, %v564_v44  ;;  %v2448_v25 = vpack.c.bf16 %v67_v42, %v66_v8 }
 0x3cc   :  { %v2501_v29 = vpop.eup %2500  ;;  %2169 = vmatprep.mubr.msk.f32.mxu1 %vm106_vm0, %v672_v31 }
 0x3cd   :  { %v2503_v34 = vpop.eup %2502  ;;  %2170 = vmatmul.mubr.msk.f32.vlgmr.msra.gmra.mrb[12].mxu1 %vm106_vm0, %v673_v30  ;;  %v675_v37 = vmul.f32 %v2501_v29, %v2122_v19 }
 0x3ce   :  { %v674_v43 = vmul.f32 %v2503_v34, %v574_v3 }
 0x3d0   :  { %2172 = vmatprep.mubr.msk.f32.mxu1 %vm106_vm0, %v674_v43 }
 0x3d1   :  { %2173 = vmatmul.mubr.msk.f32.gmra.mrb[14].mxu1 %vm106_vm0, %v675_v37 }
 0x3d2   :  { %2183 = vmatprep.mubr.msk.f32.mxu1 %vm2588_vm2, %v2586_v0 }
 0x4a0   :  { %v2171_v58 = vpop.f32.mrb[12].mxu1 }
 0x4a1   :  { %v2823_v59 = vadd.f32 %v2171_v58, %v680_v56  ;;  %v759_v60 = vpop.f32.mrb[13].mxu1  ;;  %v1271_v58 = vld [vmem:[#allocation2 + $0x38] sm:$0xff] }
 0x4a2   :  { %v2825_v63 = vadd.f32 %v759_v60, %v680_v56  ;;  %v1272_v60 = vld [vmem:[#allocation2 + $0x88] sm:$0xff] }
 0x4a4   :  { %v2414_v1 = vpack.c.bf16 %v2823_v59, %v2825_v63  ;;  %v2174_v4 = vpop.f32.mrb[14].mxu1 }
 0x4a5   :  { %v2829_v6 = vadd.f32 %v2174_v4, %v680_v56  ;;  %v769_v10 = vpop.f32.mrb[15].mxu1  ;;  %v1273_v4 = vld [vmem:[#allocation2 + $0xd8] sm:$0xff] }
 0x4a6   :  { %v2831_v33 = vadd.f32 %v769_v10, %v680_v56  ;;  %2415 = vmatpush3.bf16.msra.mxu1 %v2414_v1  ;;  %v2451_v56 = vpack.c.bf16 %v69_v21, %v68_v20  ;;  %v2454_v1 = vpack.c.bf16 %v1272_v60, %v1271_v58  ;;  %v1274_v10 = vld [vmem:[#allocation2 + $0x128] sm:$0xff] }
 0x4a7   :  { %2416 = vmatprep.subr.bf16.mxu1 %v2587_v45  ;;  %v2457_v38 = vpack.c.bf16 %v1274_v10, %v1273_v4 }
 0x4a8   :  { %v2417_v13 = vpack.c.bf16 %v2829_v6, %v2831_v33 }
 0x4aa   :  { %2418 = vmatpush3.bf16.msra.mxu1 %v2417_v13 }
 0x4ab   :  { %2427 = vmatprep.subr.bf16.mxu1 %v2587_v45 }
 0x4ad   :  { %2184 = vmatmul.mubr.msk.f32.vlgmr.msra.gmra.mrb[16].mxu1 %vm106_vm0, %v74_v17 }
 0x4ae   :  { %2429 = vmatpush3.bf16.msra.mxu1 %v2428_v18  ;;  %2194 = vmatprep.mubr.msk.f32.mxu1 %vm2588_vm2, %v2586_v0 }
 0x4af   :  { %2430 = vmatprep.subr.bf16.mxu1 %v2587_v45 }
 0x4b2   :  { %2432 = vmatpush3.bf16.msra.mxu1 %v2431_v35  ;;  %v1275_v35 = vld [vmem:[#allocation2 + $0x17b] ss:$0 sm:$0xff] }
 0x4b3   :  { %2441 = vmatprep.subr.bf16.mxu1 %v2587_v45 }
 0x580   :  { %v847_v40 = vpop.f32.mrb[16].mxu1 }
 0x581   :  { %v2185_v36 = vpop.f32.mrb[17].mxu1  ;;  %1880 = vmatmul.mubr.msk.f32.vlgmr.msra.gmra.mrb[12].mxu0 %vm106_vm0, %v847_v40  ;;  %2195 = vmatmul.mubr.msk.f32.vlgmr.msra.gmra.mrb[18].mxu1 %vm106_vm0, %v847_v40 }
 0x582   :  { %2205 = vmatprep.mubr.msk.f32.mxu0 %vm2588_vm2, %v2586_v0  ;;  %2216 = vmatprep.mubr.msk.f32.mxu1 %vm2588_vm2, %v2586_v0 }
 0x654   :  { %v950_v7 = vpop.f32.mrb[12].mxu0  ;;  %v1021_v44 = vpop.f32.mrb[18].mxu1 }
 0x655   :  { %v1022_v19 = vadd.f32 %v1021_v44, %v877_v62  ;;  %v952_v3 = vpop.f32.mrb[13].mxu0  ;;  %v2196_v9 = vpop.f32.mrb[19].mxu1  ;;  %v951_v49 = vadd.f32 %v950_v7, %v869_v48  ;;  %v72_v62 = vld [vmem:[#allocation4 + $0xa8] sm:$0xff] }
 0x656   :  { %v953_v22 = vadd.f32 %v952_v3, %v873_v2  ;;  %v73_v2 = vld [vmem:[#allocation4 + $0xb8] sm:$0xff] }
 0x657   :  { %v1029_v23 = vmul.f32 %v1022_v19, %v66_v8  ;;  %v1030_v28 = vmul.f32 %v1022_v19, %v67_v42  ;;  %v1031_v29 = vmul.f32 %v1022_v19, %v68_v20  ;;  %v1032_v34 = vmul.f32 %v1022_v19, %v69_v21 }
 0x658   :  { %v1025_v30 = vmul.f32 %v953_v22, %v66_v8  ;;  %v1026_v31 = vmul.f32 %v953_v22, %v67_v42  ;;  %v1027_v43 = vmul.f32 %v953_v22, %v68_v20  ;;  %v1028_v46 = vmul.f32 %v953_v22, %v69_v21 }
 0x659   :  { %v2442_v32 = vpack.c.bf16 %v1030_v28, %v1029_v23  ;;  %v2445_v27 = vpack.c.bf16 %v1032_v34, %v1031_v29 }
 0x65a   :  { %v2434_v37 = vpack.c.bf16 %v1026_v31, %v1025_v30  ;;  %v2438_v47 = vpack.c.bf16 %v1028_v46, %v1027_v43 }
 0x65b   :  { %2443 = vmatpush3.bf16.msra.mxu1 %v2442_v32 }
 0x65c   :  { %2436 = vmatpush3.bf16.xpose.msk.msra.mxu0 %vm2714_vm1, %v2434_v37  ;;  %2444 = vmatprep.subr.bf16.mxu1 %v2587_v45 }
 0x65d   :  { %2437 = vmatprep.subr.bf16.mxu0 %v2587_v45 }
 0x65f   :  { %2446 = vmatpush3.bf16.msra.mxu1 %v2445_v27 }
 0x660   :  { %2447 = vmatprep.subr.bf16.mxu1 %v2587_v45 }
 0x664   :  { %2440 = vmatpush3.bf16.xpose.msk.msra.mxu0 %vm2714_vm1, %v2438_v47 }
 0x665   :  { %2453 = vmatprep.subr.bf16.mxu0 %v2587_v45 }
 0x66b   :  { %2206 = vmatmul.mubr.msk.f32.vlgmr.msra.gmra.mrb[14].mxu0 %vm106_vm0, %v951_v49 }
 0x66c   :  { %2238 = vmatprep.mubr.msk.f32.mxu0 %vm2588_vm2, %v2586_v0  ;;  %2455 = vmatpush3.bf16.msra.mxu0 %v2454_v1 }
 0x66d   :  { %2456 = vmatprep.subr.bf16.mxu0 %v2587_v45 }
 0x670   :  { %2458 = vmatpush3.bf16.msra.mxu0 %v2457_v38 }
 0x73e   :  { %v1114_v39 = vpop.f32.mrb[14].mxu0 }
 0x73f   :  { %v1118_v51 = vmul.f32 0.35355338, %v1114_v39  ;;  %v2207_v52 = vpop.f32.mrb[15].mxu0 }
 0x741   :  { %v1119_v53 = vadd.f32 %v1118_v51, %v75_v50 }
 0x743   :  { %v1120_v54 = vsel %vm106_vm0, %v1119_v53, -inf }
 0x744   :  { %1121 = vmax.xlane.f32.xlu0 %v1120_v54  ;;  %v1519_v54 = vld [vmem:[#allocation2 + $0x90] sm:$0xff] }
 0x7d1   :  { %v1122_v57 = vpop.xlane.xlu0 %1121 }
 0x7d2   :  { %v1123_v55 = vsub.f32 %v1119_v53, %v1122_v57  ;;  %v1518_v53 = vld [vmem:[#allocation2 + $0x40] sm:$0xff] }
 0x7d3   :  { %v2459_v57 = vpack.c.bf16 %v1519_v54, %v1518_v53 }
 0x7d4   :  { %v1124_v24 = vmul.f32 1.442695, %v1123_v55  ;;  %v1520_v55 = vld [vmem:[#allocation2 + $0xe0] sm:$0xff] }
 0x7d6   :  { %2504 = vpow2.f32 %v1124_v24  ;;  %v1521_v24 = vld [vmem:[#allocation2 + $0x130] sm:$0xff] }
 0x7e0   :  { %v2505_v26 = vpop.eup %2504 }
 0x7e1   :  { %2217 = vmatmul.mubr.msk.f32.vlgmr.msra.gmra.mrb[20].mxu1 %vm106_vm0, %v2505_v26 }
 0x7e2   :  { %2449 = vmatpush3.bf16.msra.mxu1 %v2448_v25  ;;  %2227 = vmatprep.mubr.msk.f32.mxu1 %vm2588_vm2, %v2586_v0  ;;  %v2463_v25 = vpack.c.bf16 %v1521_v24, %v1520_v55 }
 0x7e3   :  { %2450 = vmatprep.subr.bf16.mxu1 %v2587_v45 }
 0x7e6   :  { %2452 = vmatpush3.bf16.msra.mxu1 %v2451_v56 }
 0x7e9   :  { %2228 = vmatmul.mubr.msk.f32.vlgmr.msra.gmra.mrb[22].mxu1 %vm106_vm0, %v2505_v26 }
 0x7ea   :  { %2243 = vmatprep.mubr.msk.f32.mxu1 %vm1349_vm3, %v70_v5 }
 0x8b4   :  { %v1195_v11 = vpop.f32.mrb[20].mxu1 }
 0x8b5   :  { %v2218_v13 = vpop.f32.mrb[21].mxu1 }
 0x8bc   :  { %v1265_v17 = vpop.f32.mrb[22].mxu1 }
 0x8bd   :  { %2506 = vrcp.f32 %v1265_v17  ;;  %v2229_v0 = vpop.f32.mrb[23].mxu1 }
 0x8c7   :  { %v2507_v18 = vpop.eup %2506 }
 0x8c8   :  { %v1270_v61 = vmul.f32 %v2507_v18, %v1195_v11 }
 0x8ca   :  { %2239 = vmatmul.mubr.msk.f32.vlgmr.msra.gmra.mrb[16].mxu0 %vm106_vm0, %v1270_v61  ;;  %v1455_v61 = vld [vmem:[#allocation2 + $0x146] ss:$0 sm:$0xff] }
 0x99d   :  { %v1345_v40 = vpop.f32.mrb[16].mxu0 }
 0x99e   :  { %v1346_v36 = vadd.f32 %v1345_v40, %v1275_v35  ;;  %v2240_v45 = vpop.f32.mrb[17].mxu0 }
 0x9a0   :  { %2241 = vmatprep.subr.mxu1 %v1346_v36 }
 0x9a1   :  { %2242 = vmatpush3.msra.mxu1 %v1346_v36  ;;  %v1456_v36 = vld [vmem:[#allocation2 + $0x147] ss:$0 sm:$0xff] }
 0x9a2   :  { %2244 = vmatmul.mubr.msk.f32.vlgmr.msra.gmra.mrb[24].mxu1 %vm1349_vm3, %v71_v41  ;;  %2460 = vmatprep.subr.bf16.mxu1 %v2459_v57 }
 0x9a3   :  { %2246 = vmatprep.mubr.msk.f32.mxu1 %vm1349_vm3, %v72_v62  ;;  %2462 = vmatpush3.bf16.msra.mxu1 %v2459_v57 }
 0x9a4   :  { %2464 = vmatprep.subr.bf16.mxu1 %v2463_v25 }
 0x9a6   :  { %2247 = vmatmul.mubr.msk.f32.gmra.mrb[26].mxu1 %vm1349_vm3, %v73_v2 }
 0x9a7   :  { %2466 = vmatpush3.bf16.msra.mxu1 %v2463_v25 }
 0xa75   :  { %v2245_v7 = vpop.f32.mrb[24].mxu1 }
 0xa76   :  { %v1448_v8 = vadd.f32 %v2245_v7, %v2823_v59  ;;  %v1428_v42 = vpop.f32.mrb[25].mxu1 }
 0xa77   :  { %v1447_v44 = vadd.f32 %v1428_v42, %v2825_v63 }
 0xa78   :  { %v1452_v19 = vadd.f32 %v1448_v8, %v2647_v14 }
 0xa79   :  { %v2248_v3 = vpop.f32.mrb[26].mxu1  ;;  %v1451_v9 = vadd.f32 %v1447_v44, %v2637_v12 }
 0xa7a   :  { %v1450_v20 = vadd.f32 %v2248_v3, %v2829_v6  ;;  %v1438_v21 = vpop.f32.mrb[27].mxu1  ;;  %v1460_v22 = vsel %vm106_vm0, %v1452_v19, 0.0 }
 0xa7b   :  { %v1449_v23 = vadd.f32 %v1438_v21, %v2831_v33  ;;  %1461 = vadd.xlane.f32.xlu0 %v1460_v22  ;;  %v1457_v28 = vsel %vm106_vm0, %v1451_v9, 0.0  ;;  %v1656_v21 = vld [vmem:[#allocation2 + $0x48] sm:$0xff]  ;;  %v1657_v22 = vld [vmem:[#allocation2 + $0x98] sm:$0xff] }
 0xa7c   :  { %1458 = vadd.xlane.f32.xlu1 %v1457_v28  ;;  %v1454_v59 = vadd.f32 %v1450_v20, %v2663_v16  ;;  %v1658_v28 = vld [vmem:[#allocation2 + $0xe8] sm:$0xff] }
 0xa7d   :  { %v1453_v63 = vadd.f32 %v1449_v23, %v2655_v15  ;;  %v2467_v23 = vpack.c.bf16 %v1657_v22, %v1656_v21 }
 0xa7e   :  { %v1466_v14 = vsel %vm106_vm0, %v1454_v59, 0.0 }
 0xa7f   :  { %1467 = vadd.xlane.f32.xlu0 %v1466_v14  ;;  %v1463_v12 = vsel %vm106_vm0, %v1453_v63, 0.0  ;;  %2469 = vmatprep.subr.msk.bf16.mxu0 %vm2468_vm5, %v2467_v23  ;;  %v1522_v14 = vld [vmem:[#allocation2 + $0x184] ss:$0 sm:$0xff] }
 0xa80   :  { %1464 = vadd.xlane.f32.xlu1 %v1463_v12  ;;  %2472 = vmatpush3.bf16.xpose.msk.msra.mxu0 %vm2468_vm5, %v2467_v23 }
 0xb08   :  { %v1462_v6 = vpop.xlane.xlu0 %1461 }
 0xb09   :  { %v1471_v30 = vmul.f32 0.03125, %v1462_v6  ;;  %v1459_v31 = vpop.xlane.xlu1 %1458 }
 0xb0a   :  { %v1470_v29 = vmul.f32 0.03125, %v1459_v31 }
 0xb0b   :  { %v1475_v34 = vsub.f32 %v1452_v19, %v1471_v30 }
 0xb0c   :  { %v1474_v33 = vsub.f32 %v1451_v9, %v1470_v29  ;;  %v1468_v32 = vpop.xlane.xlu0 %1467 }
 0xb0d   :  { %v1473_v37 = vmul.f32 0.03125, %v1468_v32  ;;  %v1465_v27 = vpop.xlane.xlu1 %1464  ;;  %v1479_v43 = vmul.f32 %v1475_v34, %v1475_v34 }
 0xb0e   :  { %v1472_v46 = vmul.f32 0.03125, %v1465_v27  ;;  %v1478_v16 = vmul.f32 %v1474_v33, %v1474_v33 }
 0xb0f   :  { %v1477_v47 = vsub.f32 %v1454_v59, %v1473_v37  ;;  %v1485_v15 = vsel %vm106_vm0, %v1479_v43, 0.0  ;;  %v1659_v59 = vld [vmem:[#allocation2 + $0x138] sm:$0xff] }
 0xb10   :  { %v1476_v48 = vsub.f32 %v1453_v63, %v1472_v46  ;;  %1486 = vadd.xlane.f32.xlu0 %v1485_v15  ;;  %v1482_v49 = vsel %vm106_vm0, %v1478_v16, 0.0  ;;  %v2473_v63 = vpack.c.bf16 %v1659_v59, %v1658_v28 }
 0xb11   :  { %1483 = vadd.xlane.f32.xlu1 %v1482_v49  ;;  %v1481_v39 = vmul.f32 %v1477_v47, %v1477_v47 }
 0xb12   :  { %v1480_v50 = vmul.f32 %v1476_v48, %v1476_v48  ;;  %2475 = vmatprep.subr.msk.bf16.mxu0 %vm2468_vm5, %v2473_v63 }
 0xb13   :  { %v1491_v51 = vsel %vm106_vm0, %v1481_v39, 0.0  ;;  %2478 = vmatpush3.bf16.xpose.msk.msra.mxu0 %vm2468_vm5, %v2473_v63 }
 0xb14   :  { %1492 = vadd.xlane.f32.xlu0 %v1491_v51  ;;  %v1488_v52 = vsel %vm106_vm0, %v1480_v50, 0.0 }
 0xb15   :  { %1489 = vadd.xlane.f32.xlu1 %v1488_v52 }
 0xb9d   :  { %v1487_v26 = vpop.xlane.xlu0 %1486 }
 0xb9e   :  { %v1495_v56 = vmul.f32 0.03125, %v1487_v26  ;;  %v1484_v58 = vpop.xlane.xlu1 %1483 }
 0xb9f   :  { %v1494_v60 = vmul.f32 0.03125, %v1484_v58 }
 0xba0   :  { %v1499_v1 = vadd.f32 1e-05, %v1495_v56 }
 0xba1   :  { %v1498_v4 = vadd.f32 1e-05, %v1494_v60  ;;  %v1493_v10 = vpop.xlane.xlu0 %1492 }
 0xba2   :  { %2508 = vrsqrt.f32 %v1499_v1  ;;  %v1497_v38 = vmul.f32 0.03125, %v1493_v10  ;;  %v1490_v11 = vpop.xlane.xlu1 %1489 }
 0xba3   :  { %2510 = vrsqrt.f32 %v1498_v4  ;;  %v1496_v13 = vmul.f32 0.03125, %v1490_v11 }
 0xba4   :  { %v1501_v17 = vadd.f32 1e-05, %v1497_v38 }
 0xba5   :  { %v1500_v0 = vadd.f32 1e-05, %v1496_v13 }
 0xba6   :  { %2512 = vrsqrt.f32 %v1501_v17 }
 0xba7   :  { %2514 = vrsqrt.f32 %v1500_v0 }
 0xbac   :  { %v2509_v18 = vpop.eup %2508 }
 0xbad   :  { %v2511_v5 = vpop.eup %2510  ;;  %v1507_v35 = vmul.f32 %v2509_v18, %v1475_v34 }
 0xbae   :  { %v1506_v40 = vmul.f32 %v2511_v5, %v1474_v33 }
 0xbaf   :  { %v1511_v45 = vmul.f32 %v1507_v35, %v1455_v61 }
 0xbb0   :  { %v2513_v41 = vpop.eup %2512  ;;  %v1510_v62 = vmul.f32 %v1506_v40, %v1455_v61 }
 0xbb1   :  { %v2515_v2 = vpop.eup %2514  ;;  %v1509_v7 = vmul.f32 %v2513_v41, %v1477_v47  ;;  %v2891_v44 = vadd.f32 %v1511_v45, %v1456_v36 }
 0xbb2   :  { %v2889_v8 = vadd.f32 %v1510_v62, %v1456_v36  ;;  %v1508_v42 = vmul.f32 %v2515_v2, %v1476_v48 }
 0xbb3   :  { %v1513_v19 = vmul.f32 %v1509_v7, %v1455_v61 }
 0xbb4   :  { %2257 = vmatprep.mubr.msk.f32.mxu1 %vm106_vm0, %v2889_v8  ;;  %v1512_v3 = vmul.f32 %v1508_v42, %v1455_v61 }
 0xbb5   :  { %2258 = vmatmul.mubr.msk.f32.vlgmr.msra.gmra.mrb[28].mxu1 %vm106_vm0, %v2891_v44  ;;  %v2899_v20 = vadd.f32 %v1513_v19, %v1456_v36 }
 0xbb6   :  { %v2897_v9 = vadd.f32 %v1512_v3, %v1456_v36  ;;  %v1660_v36 = vld [vmem:[#allocation2 + $0x18d] ss:$0 sm:$0xff] }
 0xbb8   :  { %2260 = vmatprep.mubr.msk.f32.mxu1 %vm106_vm0, %v2897_v9 }
 0xbb9   :  { %2261 = vmatmul.mubr.msk.f32.gmra.mrb[30].mxu1 %vm106_vm0, %v2899_v20 }
 0xc88   :  { %v2259_v12 = vpop.f32.mrb[28].mxu1 }
 0xc89   :  { %v1607_v6 = vadd.f32 %v2259_v12, %v1522_v14  ;;  %v1601_v30 = vpop.f32.mrb[29].mxu1 }
 0xc8a   :  { %v1602_v31 = vadd.f32 %v1601_v30, %v1522_v14 }
 0xc8b   :  { %v1625_v29 = vmul.f32 %v1607_v6, %v1607_v6  ;;  %v1621_v10 = vmul.f32 0.5, %v1607_v6 }
 0xc8c   :  { %v1624_v34 = vmul.f32 %v1602_v31, %v1602_v31  ;;  %v2262_v33 = vpop.f32.mrb[30].mxu1  ;;  %v1620_v1 = vmul.f32 0.5, %v1602_v31 }
 0xc8d   :  { %v1629_v32 = vmul.f32 %v1625_v29, %v1607_v6  ;;  %v1617_v37 = vadd.f32 %v2262_v33, %v1522_v14  ;;  %v1611_v27 = vpop.f32.mrb[31].mxu1 }
 0xc8e   :  { %v1628_v43 = vmul.f32 %v1624_v34, %v1602_v31  ;;  %v1612_v46 = vadd.f32 %v1611_v27, %v1522_v14 }
 0xc8f   :  { %v1633_v16 = vmul.f32 0.044715, %v1629_v32  ;;  %v1627_v47 = vmul.f32 %v1617_v37, %v1617_v37  ;;  %v1623_v5 = vmul.f32 0.5, %v1617_v37 }
 0xc90   :  { %v1632_v15 = vmul.f32 0.044715, %v1628_v43  ;;  %v1626_v48 = vmul.f32 %v1612_v46, %v1612_v46  ;;  %v1622_v18 = vmul.f32 0.5, %v1612_v46 }
 0xc91   :  { %v1637_v49 = vadd.f32 %v1633_v16, %v1607_v6  ;;  %v1631_v39 = vmul.f32 %v1627_v47, %v1617_v37 }
 0xc92   :  { %v1636_v50 = vadd.f32 %v1632_v15, %v1602_v31  ;;  %v1630_v51 = vmul.f32 %v1626_v48, %v1612_v46 }
 0xc93   :  { %v1641_v52 = vmul.f32 0.7978846, %v1637_v49  ;;  %v1635_v53 = vmul.f32 0.044715, %v1631_v39 }
 0xc94   :  { %v1640_v54 = vmul.f32 0.7978846, %v1636_v50  ;;  %v1634_v57 = vmul.f32 0.044715, %v1630_v51 }
 0xc95   :  { %2516 = vtanh.f32 %v1641_v52  ;;  %v1639_v55 = vadd.f32 %v1635_v53, %v1617_v37 }
 0xc96   :  { %2518 = vtanh.f32 %v1640_v54  ;;  %v1638_v24 = vadd.f32 %v1634_v57, %v1612_v46 }
 0xc97   :  { %v1643_v25 = vmul.f32 0.7978846, %v1639_v55 }
 0xc98   :  { %v1642_v26 = vmul.f32 0.7978846, %v1638_v24 }
 0xc99   :  { %2520 = vtanh.f32 %v1643_v25 }
 0xc9a   :  { %2522 = vtanh.f32 %v1642_v26 }
 0xc9f   :  { %v2517_v56 = vpop.eup %2516 }
 0xca0   :  { %v2519_v58 = vpop.eup %2518  ;;  %v1649_v60 = vadd.f32 1.0, %v2517_v56 }
 0xca1   :  { %v1648_v4 = vadd.f32 1.0, %v2519_v58 }
 0xca2   :  { %v1653_v17 = vmul.f32 %v1649_v60, %v1621_v10  ;;  %v1775_v60 = vld [vmem:[#allocation2 + $0x190] ss:$0 sm:$0xff]  ;;  %v1776_v10 = vld [vmem:[#allocation2 + $0x191] ss:$0 sm:$0xff] }
 0xca3   :  { %v2521_v38 = vpop.eup %2520  ;;  %v1652_v11 = vmul.f32 %v1648_v4, %v1620_v1 }
 0xca4   :  { %v2523_v13 = vpop.eup %2522  ;;  %v1651_v0 = vadd.f32 1.0, %v2521_v38 }
 0xca5   :  { %2271 = vmatprep.mubr.msk.f32.mxu0 %vm1661_vm4, %v1652_v11  ;;  %v1650_v61 = vadd.f32 1.0, %v2523_v13 }
 0xca6   :  { %2272 = vmatmul.mubr.msk.f32.vlgmr.msra.gmra.mrb[18].mxu0 %vm1661_vm4, %v1653_v17  ;;  %v1655_v40 = vmul.f32 %v1651_v0, %v1623_v5 }
 0xca7   :  { %v1654_v35 = vmul.f32 %v1650_v61, %v1622_v18 }
 0xca9   :  { %2274 = vmatprep.mubr.msk.f32.mxu0 %vm1661_vm4, %v1654_v35 }
 0xcaa   :  { %2275 = vmatmul.mubr.msk.f32.gmra.mrb[20].mxu0 %vm1661_vm4, %v1655_v40 }
 0xd79   :  { %v2273_v45 = vpop.f32.mrb[18].mxu0 }
 0xd7a   :  { %v1758_v41 = vadd.f32 %v2273_v45, %v1660_v36  ;;  %v1752_v62 = vpop.f32.mrb[19].mxu0 }
 0xd7b   :  { %v1753_v2 = vadd.f32 %v1752_v62, %v1660_v36 }
 0xd7c   :  { %v1772_v7 = vadd.f32 %v1758_v41, %v2891_v44 }
 0xd7d   :  { %v2276_v42 = vpop.f32.mrb[20].mxu0  ;;  %v1771_v19 = vadd.f32 %v1753_v2, %v2889_v8 }
 0xd7e   :  { %v1768_v3 = vadd.f32 %v2276_v42, %v1660_v36  ;;  %v1762_v21 = vpop.f32.mrb[21].mxu0  ;;  %v1780_v22 = vsel %vm106_vm0, %v1772_v7, 0.0 }
 0xd7f   :  { %v1763_v23 = vadd.f32 %v1762_v21, %v1660_v36  ;;  %1781 = vadd.xlane.f32.xlu0 %v1780_v22  ;;  %v1777_v28 = vsel %vm106_vm0, %v1771_v19, 0.0 }
 0xd80   :  { %1778 = vadd.xlane.f32.xlu1 %v1777_v28  ;;  %v1774_v59 = vadd.f32 %v1768_v3, %v2899_v20 }
 0xd81   :  { %v1773_v63 = vadd.f32 %v1763_v23, %v2897_v9 }
 0xd82   :  { %v1786_v14 = vsel %vm106_vm0, %v1774_v59, 0.0 }
 0xd83   :  { %1787 = vadd.xlane.f32.xlu0 %v1786_v14  ;;  %v1783_v44 = vsel %vm106_vm0, %v1773_v63, 0.0 }
 0xd84   :  { %1784 = vadd.xlane.f32.xlu1 %v1783_v44 }
 0xe0c   :  { %v1782_v8 = vpop.xlane.xlu0 %1781 }
 0xe0d   :  { %v1790_v12 = vmul.f32 0.03125, %v1782_v8  ;;  %v1779_v6 = vpop.xlane.xlu1 %1778 }
 0xe0e   :  { %v1789_v30 = vmul.f32 0.03125, %v1779_v6 }
 0xe0f   :  { %v1794_v31 = vsub.f32 %v1772_v7, %v1790_v12 }
 0xe10   :  { %v1793_v29 = vsub.f32 %v1771_v19, %v1789_v30  ;;  %v1788_v34 = vpop.xlane.xlu0 %1787 }
 0xe11   :  { %v1792_v33 = vmul.f32 0.03125, %v1788_v34  ;;  %v1785_v32 = vpop.xlane.xlu1 %1784  ;;  %v1798_v37 = vmul.f32 %v1794_v31, %v1794_v31 }
 0xe12   :  { %v1791_v27 = vmul.f32 0.03125, %v1785_v32  ;;  %v1797_v20 = vmul.f32 %v1793_v29, %v1793_v29 }
 0xe13   :  { %v1796_v43 = vsub.f32 %v1774_v59, %v1792_v33  ;;  %v1804_v9 = vsel %vm106_vm0, %v1798_v37, 0.0 }
 0xe14   :  { %v1795_v46 = vsub.f32 %v1773_v63, %v1791_v27  ;;  %1805 = vadd.xlane.f32.xlu0 %v1804_v9  ;;  %v1801_v16 = vsel %vm106_vm0, %v1797_v20, 0.0 }
 0xe15   :  { %1802 = vadd.xlane.f32.xlu1 %v1801_v16  ;;  %v1800_v47 = vmul.f32 %v1796_v43, %v1796_v43 }
 0xe16   :  { %v1799_v15 = vmul.f32 %v1795_v46, %v1795_v46 }
 0xe17   :  { %v1810_v48 = vsel %vm106_vm0, %v1800_v47, 0.0 }
 0xe18   :  { %1811 = vadd.xlane.f32.xlu0 %v1810_v48  ;;  %v1807_v49 = vsel %vm106_vm0, %v1799_v15, 0.0 }
 0xe19   :  { %1808 = vadd.xlane.f32.xlu1 %v1807_v49 }
 0xea1   :  { %v1806_v39 = vpop.xlane.xlu0 %1805 }
 0xea2   :  { %v1814_v50 = vmul.f32 0.03125, %v1806_v39  ;;  %v1803_v51 = vpop.xlane.xlu1 %1802 }
 0xea3   :  { %v1813_v52 = vmul.f32 0.03125, %v1803_v51 }
 0xea4   :  { %v1818_v53 = vadd.f32 1e-05, %v1814_v50 }
 0xea5   :  { %v1817_v54 = vadd.f32 1e-05, %v1813_v52  ;;  %v1812_v57 = vpop.xlane.xlu0 %1811 }
 0xea6   :  { %2524 = vrsqrt.f32 %v1818_v53  ;;  %v1816_v55 = vmul.f32 0.03125, %v1812_v57  ;;  %v1809_v24 = vpop.xlane.xlu1 %1808 }
 0xea7   :  { %2526 = vrsqrt.f32 %v1817_v54  ;;  %v1815_v25 = vmul.f32 0.03125, %v1809_v24 }
 0xea8   :  { %v1820_v26 = vadd.f32 1e-05, %v1816_v55 }
 0xea9   :  { %v1819_v56 = vadd.f32 1e-05, %v1815_v25 }
 0xeaa   :  { %2528 = vrsqrt.f32 %v1820_v26 }
 0xeab   :  { %2530 = vrsqrt.f32 %v1819_v56 }
 0xeb0   :  { %v2525_v58 = vpop.eup %2524 }
 0xeb1   :  { %v2527_v1 = vpop.eup %2526  ;;  %v1826_v4 = vmul.f32 %v2525_v58, %v1794_v31 }
 0xeb2   :  { %v1825_v38 = vmul.f32 %v2527_v1, %v1793_v29 }
 0xeb3   :  { %v1830_v11 = vmul.f32 %v1826_v4, %v1775_v60 }
 0xeb4   :  { %v2529_v13 = vpop.eup %2528  ;;  %v1829_v17 = vmul.f32 %v1825_v38, %v1775_v60 }
 0xeb5   :  { %v2531_v0 = vpop.eup %2530  ;;  %v1834_v18 = vadd.f32 %v1830_v11, %v1776_v10  ;;  %v1828_v61 = vmul.f32 %v2529_v13, %v1796_v43 }
 0xeb6   :  { %v1833_v5 = vadd.f32 %v1829_v17, %v1776_v10  ;;  %v1827_v35 = vmul.f32 %v2531_v0, %v1795_v46 }
 0xeb7   :  { %1838 = vst.msk [vmem:[%s2942_s3 + $0x8] sm:$0xff] %vm106_vm0, %v1834_v18  ;;  %v1832_v40 = vmul.f32 %v1828_v61, %v1775_v60 }
 0xeb8   :  { %1837 = vst.msk [vmem:[%s2942_s3] sm:$0xff] %vm106_vm0, %v1833_v5  ;;  %v1831_v36 = vmul.f32 %v1827_v35, %v1775_v60 }
 0xeb9   :  { %v1836_v45 = vadd.f32 %v1832_v40, %v1776_v10 }
 0xeba   :  { %v1835_v41 = vadd.f32 %v1831_v36, %v1776_v10 }
 0xebb   :  { %1840 = vst.msk [vmem:[%s2942_s3 + $0x18] sm:$0xff] %vm106_vm0, %v1836_v45 }
 0xebc   :  { %1839 = vst.msk [vmem:[%s2942_s3 + $0x10] sm:$0xff] %vm106_vm0, %v1835_v41 }
 0xebd   :  { %1845 = vsyncpa [#allocation3], 1 }
 0xebe   :  { %1846 = vsyncpa [#allocation5], 1 }

</bundles_post_ra>
